<compile_context>
chip_gen: v5e
topology: v5e:2x2
jax: 0.10.0
libtpu: 0.0.40
codegen_flags: <defaults>
</compile_context>

<pallas_src>
import functools

import jax
import jax.numpy as jnp
from jax.experimental import pallas as pl
from jax.experimental.pallas import tpu as pltpu


MXU_DTYPE = jnp.bfloat16   # matmul operand dtype; accumulation is always f32


# ----------------------------- config ---------------------------------------
class Config:
    word_embedding_dimension = 32
    rnn_hidden_size = 32
    rnn_layer_size = 2
    label_num = 2
    cnn_output_size = 8


# ------------------- fused LSTM-stack + Linear head kernel -------------------
def _rnn_fused_kernel(*refs, num_layers, seq_len, batch_pad, hidden, last_row):
    """Whole forward in one launch, everything VMEM-resident.

    refs (in order):
      x_flat (S*Bp, E)                              f32
      per layer l: w_ih (in_dim, 4H)  MXU_DTYPE
                   w_hh (H, 4H)       MXU_DTYPE
                   b    (1, 4H)       f32   (= b_ih + b_hh)
      h0 (L, Bp, H) f32, c0 (L, Bp, H) f32
      lin_w (H, out_dim) f32, lin_b (1, out_dim) f32
      out (1, out_dim) f32                           [output]
      act (S*Bp, H) f32                              [VMEM scratch]
    """
    H = hidden
    Bp = batch_pad
    S = seq_len

    x_ref = refs[0]
    layer_refs = []
    base = 1
    for _ in range(num_layers):
        layer_refs.append((refs[base], refs[base + 1], refs[base + 2]))
        base += 3
    h0_ref, c0_ref, linw_ref, linb_ref, out_ref, act_ref = refs[base:base + 6]

    cur_in = x_ref[...]                                 # (S*Bp, in_dim) f32
    h = None
    for l, (wih_ref, whh_ref, b_ref) in enumerate(layer_refs):
        wih = wih_ref[...]
        whh = whh_ref[...]
        mdt = wih.dtype
        is_last = (l == num_layers - 1)

        # Hoisted input projection: one batched MXU matmul for all time steps
        # (also folds the bias broadcast out of the recurrence).
        xp = (jnp.dot(cur_in.astype(mdt), wih,
                      preferred_element_type=jnp.float32)
              + b_ref[...])                             # (S*Bp, 4H) f32

        h = h0_ref[l]                                   # (Bp, H) f32
        c = c0_ref[l]                                   # (Bp, H) f32

        # Fully unrolled recurrence (S is a small static trip count).
        for t in range(S):
            gates = xp[t * Bp:(t + 1) * Bp, :] + jnp.dot(
                h.astype(mdt), whh, preferred_element_type=jnp.float32)
            # Whole-vreg nonlinearities, then slice (gate order i, f, g, o).
            sig = jax.nn.sigmoid(gates)                 # (Bp, 4H)
            tnh = jnp.tanh(gates)                       # (Bp, 4H)
            c = (sig[:, 1 * H:2 * H] * c
                 + sig[:, 0 * H:1 * H] * tnh[:, 2 * H:3 * H])
            h = sig[:, 3 * H:4 * H] * jnp.tanh(c)
            if not is_last:
                # Bp-aligned, static-offset store of this step's hidden state.
                act_ref[t * Bp:(t + 1) * Bp, :] = h

        if not is_last:
            cur_in = act_ref[...]                       # next layer's input

    # Linear head on final_hidden_state[-1, last_row]  (last layer, last real
    # batch element); padded rows never reach the output.
    h_sel = h[last_row:last_row + 1, :]                 # (1, H)
    out_ref[...] = (jnp.dot(h_sel, linw_ref[...],
                            preferred_element_type=jnp.float32)
                    + linb_ref[...])


def fused_rnn_forward(x_flat, lstm_params, h0, c0, lin_w, lin_b,
                      *, seq_len, batch_pad, hidden, last_row):
    L = len(lstm_params)
    out_dim = lin_w.shape[1]
    vmem = pl.BlockSpec(memory_space=pltpu.MemorySpace.VMEM)

    flat_inputs = [x_flat]
    for p in lstm_params:
        flat_inputs += [p["w_ih"], p["w_hh"], p["b"]]
    flat_inputs += [h0, c0, lin_w, lin_b]

    kernel = functools.partial(
        _rnn_fused_kernel, num_layers=L, seq_len=seq_len,
        batch_pad=batch_pad, hidden=hidden, last_row=last_row)

    return pl.pallas_call(
        kernel,
        out_shape=jax.ShapeDtypeStruct((1, out_dim), jnp.float32),
        in_specs=[vmem] * len(flat_inputs),
        out_specs=vmem,
        scratch_shapes=[pltpu.VMEM((seq_len * batch_pad, hidden), jnp.float32)],
    )(*flat_inputs)


# ----------------------- parameter initialization ---------------------------
def init_params(key, config):
    E = config.word_embedding_dimension
    H = config.rnn_hidden_size
    L = config.rnn_layer_size
    out_dim = config.label_num * config.cnn_output_size
    k = 1.0 / jnp.sqrt(jnp.float32(H))

    # NOTE: weights stored as (in_dim, 4H), i.e. transposed vs. PyTorch's
    # weight_ih_l{k} (4H, in_dim); transpose if loading a real nn.LSTM ckpt.
    params = {"lstm": []}
    for layer in range(L):
        in_dim = E if layer == 0 else H
        key, k1, k2, k3, k4 = jax.random.split(key, 5)
        w_ih = jax.random.uniform(k1, (in_dim, 4 * H), jnp.float32, -k, k)
        w_hh = jax.random.uniform(k2, (H, 4 * H), jnp.float32, -k, k)
        b_ih = jax.random.uniform(k3, (1, 4 * H), jnp.float32, -k, k)
        b_hh = jax.random.uniform(k4, (1, 4 * H), jnp.float32, -k, k)
        params["lstm"].append({
            "w_ih": w_ih.astype(MXU_DTYPE),   # MXU operand dtype
            "w_hh": w_hh.astype(MXU_DTYPE),
            "b": b_ih + b_hh,                 # bias stays f32 (hoisted add)
        })

    key, k1, k2 = jax.random.split(key, 3)
    params["lin_w"] = jax.random.uniform(k1, (H, out_dim), jnp.float32, -k, k)
    params["lin_b"] = jax.random.uniform(k2, (1, out_dim), jnp.float32, -k, k)
    return params


# ------------------------------ forward --------------------------------------
def rnn_forward(params, x, config, hc_key):
    """Mirrors RNN.forward: random (h0, c0) each call, multi-layer LSTM,
    Linear on final_hidden_state[-1, -1], reshape to (label_num, cnn_out)."""
    L = config.rnn_layer_size
    H = config.rnn_hidden_size
    seq_len, batch, E = x.shape

    # torch.randn h0/c0 each forward -> deterministic equivalent via fixed key.
    k0, k1 = jax.random.split(hc_key)
    h0 = jax.random.normal(k0, (L, batch, H), jnp.float32)
    c0 = jax.random.normal(k1, (L, batch, H), jnp.float32)

    # Pad batch to a multiple of 8 sublanes; padded rows are independent and
    # never selected by the head.
    Bp = ((batch + 7) // 8) * 8
    pad = Bp - batch
    x_p = jnp.pad(x, ((0, 0), (0, pad), (0, 0)))
    h0_p = jnp.pad(h0, ((0, 0), (0, pad), (0, 0)))
    c0_p = jnp.pad(c0, ((0, 0), (0, pad), (0, 0)))
    x_flat = x_p.reshape(seq_len * Bp, E)               # row s*Bp + b = x[s, b]

    out = fused_rnn_forward(
        x_flat, params["lstm"], h0_p, c0_p, params["lin_w"], params["lin_b"],
        seq_len=seq_len, batch_pad=Bp, hidden=H, last_row=batch - 1)
    return out.reshape(config.label_num, config.cnn_output_size)


# -------------------------------- main ----------------------------------------
if __name__ == "__main__":
    cfg = Config()
    seq_len, batch = 8, 4

    root = jax.random.PRNGKey(0)
    k_params, k_x, k_hc = jax.random.split(root, 3)

    params = init_params(k_params, cfg)
    x = jax.random.normal(
        k_x, (seq_len, batch, cfg.word_embedding_dimension), jnp.float32)

    fwd = jax.jit(lambda p, xx, key: rnn_forward(p, xx, cfg, key))
    out = fwd(params, x, k_hc)
    out = jax.block_until_ready(out)

    assert out.shape == (cfg.label_num, cfg.cnn_output_size)
    print("KERNEL_OK")
</pallas_src>

<mosaic_0001>
module attributes {stable_mosaic.version = 11 : i64} {
  func.func @_rnn_fused_kernel(%arg0: memref<64x32xf32, #tpu.memory_space<vmem>>, %arg1: memref<32x128xbf16, #tpu.memory_space<vmem>>, %arg2: memref<32x128xbf16, #tpu.memory_space<vmem>>, %arg3: memref<1x128xf32, #tpu.memory_space<vmem>>, %arg4: memref<32x128xbf16, #tpu.memory_space<vmem>>, %arg5: memref<32x128xbf16, #tpu.memory_space<vmem>>, %arg6: memref<1x128xf32, #tpu.memory_space<vmem>>, %arg7: memref<2x8x32xf32, #tpu.memory_space<vmem>>, %arg8: memref<2x8x32xf32, #tpu.memory_space<vmem>>, %arg9: memref<32x16xf32, #tpu.memory_space<vmem>>, %arg10: memref<1x16xf32, #tpu.memory_space<vmem>>, %arg11: memref<1x16xf32, #tpu.memory_space<vmem>>, %arg12: memref<64x32xf32, #tpu.memory_space<vmem>>) attributes {dimension_semantics = [], scalar_prefetch = 0 : i64, scratch_operands = 1 : i64, tpu.core_type = #tpu.core_type<tc>} {
    %c0 = arith.constant 0 : index
    %c0_0 = arith.constant 0 : index
    %0 = vector.load %arg0[%c0, %c0_0] : memref<64x32xf32, #tpu.memory_space<vmem>>, vector<64x32xf32>
    %c0_1 = arith.constant 0 : index
    %c0_2 = arith.constant 0 : index
    %1 = vector.load %arg1[%c0_1, %c0_2] : memref<32x128xbf16, #tpu.memory_space<vmem>>, vector<32x128xbf16>
    %c0_3 = arith.constant 0 : index
    %c0_4 = arith.constant 0 : index
    %2 = vector.load %arg2[%c0_3, %c0_4] : memref<32x128xbf16, #tpu.memory_space<vmem>>, vector<32x128xbf16>
    %3 = arith.truncf %0 : vector<64x32xf32> to vector<64x32xbf16>
    %cst = arith.constant dense<0.000000e+00> : vector<64x128xf32>
    %4 = tpu.matmul %3, %1, %cst {dimension_numbers = #tpu.dot_dimension_numbers<[1], [0], [0], [1], [0, 0, 1, 1], [], []>} : vector<64x32xbf16>, vector<32x128xbf16>, vector<64x128xf32> -> vector<64x128xf32>
    %c0_5 = arith.constant 0 : index
    %c0_6 = arith.constant 0 : index
    %5 = vector.load %arg3[%c0_5, %c0_6] : memref<1x128xf32, #tpu.memory_space<vmem>>, vector<1x128xf32>
    %6 = vector.broadcast %5 : vector<1x128xf32> to vector<64x128xf32>
    %7 = arith.addf %4, %6 : vector<64x128xf32>
    %c0_7 = arith.constant 0 : index
    %c0_8 = arith.constant 0 : index
    %c0_9 = arith.constant 0 : index
    %8 = vector.load %arg7[%c0_7, %c0_8, %c0_9] : memref<2x8x32xf32, #tpu.memory_space<vmem>>, vector<1x8x32xf32>
    %9 = vector.shape_cast %8 : vector<1x8x32xf32> to vector<8x32xf32>
    %c0_10 = arith.constant 0 : index
    %c0_11 = arith.constant 0 : index
    %c0_12 = arith.constant 0 : index
    %10 = vector.load %arg8[%c0_10, %c0_11, %c0_12] : memref<2x8x32xf32, #tpu.memory_space<vmem>>, vector<1x8x32xf32>
    %11 = vector.shape_cast %10 : vector<1x8x32xf32> to vector<8x32xf32>
    %12 = vector.extract_strided_slice %7 {offsets = [0, 0], sizes = [8, 128], strides = [1, 1]} : vector<64x128xf32> to vector<8x128xf32>
    %13 = arith.truncf %9 : vector<8x32xf32> to vector<8x32xbf16>
    %cst_13 = arith.constant dense<0.000000e+00> : vector<8x128xf32>
    %14 = tpu.matmul %13, %2, %cst_13 {dimension_numbers = #tpu.dot_dimension_numbers<[1], [0], [0], [1], [0, 0, 1, 1], [], []>} : vector<8x32xbf16>, vector<32x128xbf16>, vector<8x128xf32> -> vector<8x128xf32>
    %15 = arith.addf %12, %14 : vector<8x128xf32>
    %16 = arith.negf %15 : vector<8x128xf32>
    %17 = math.exp %16 : vector<8x128xf32>
    %cst_14 = arith.constant 1.000000e+00 : f32
    %18 = vector.broadcast %cst_14 : f32 to vector<8x128xf32>
    %19 = arith.addf %18, %17 : vector<8x128xf32>
    %20 = arith.divf %18, %19 : vector<8x128xf32>
    %21 = math.tanh %15 : vector<8x128xf32>
    %22 = vector.extract_strided_slice %20 {offsets = [0, 32], sizes = [8, 32], strides = [1, 1]} : vector<8x128xf32> to vector<8x32xf32>
    %23 = arith.mulf %22, %11 : vector<8x32xf32>
    %24 = vector.extract_strided_slice %20 {offsets = [0, 0], sizes = [8, 32], strides = [1, 1]} : vector<8x128xf32> to vector<8x32xf32>
    %25 = vector.extract_strided_slice %21 {offsets = [0, 64], sizes = [8, 32], strides = [1, 1]} : vector<8x128xf32> to vector<8x32xf32>
    %26 = arith.mulf %24, %25 : vector<8x32xf32>
    %27 = arith.addf %23, %26 : vector<8x32xf32>
    %28 = vector.extract_strided_slice %20 {offsets = [0, 96], sizes = [8, 32], strides = [1, 1]} : vector<8x128xf32> to vector<8x32xf32>
    %29 = math.tanh %27 : vector<8x32xf32>
    %30 = arith.mulf %28, %29 : vector<8x32xf32>
    %c0_15 = arith.constant 0 : index
    %c0_16 = arith.constant 0 : index
    %31 = vector.load %arg12[%c0_15, %c0_16] : memref<64x32xf32, #tpu.memory_space<vmem>>, vector<8x32xf32>
    tpu.vector_store %arg12[%c0_15, %c0_16], %30 {strides = array<i32>} : memref<64x32xf32, #tpu.memory_space<vmem>>, vector<8x32xf32>,
    %32 = vector.extract_strided_slice %7 {offsets = [8, 0], sizes = [8, 128], strides = [1, 1]} : vector<64x128xf32> to vector<8x128xf32>
    %33 = arith.truncf %30 : vector<8x32xf32> to vector<8x32xbf16>
    %cst_17 = arith.constant dense<0.000000e+00> : vector<8x128xf32>
    %34 = tpu.matmul %33, %2, %cst_17 {dimension_numbers = #tpu.dot_dimension_numbers<[1], [0], [0], [1], [0, 0, 1, 1], [], []>} : vector<8x32xbf16>, vector<32x128xbf16>, vector<8x128xf32> -> vector<8x128xf32>
    %35 = arith.addf %32, %34 : vector<8x128xf32>
    %36 = arith.negf %35 : vector<8x128xf32>
    %37 = math.exp %36 : vector<8x128xf32>
    %cst_18 = arith.constant 1.000000e+00 : f32
    %38 = vector.broadcast %cst_18 : f32 to vector<8x128xf32>
    %39 = arith.addf %38, %37 : vector<8x128xf32>
    %40 = arith.divf %38, %39 : vector<8x128xf32>
    %41 = math.tanh %35 : vector<8x128xf32>
    %42 = vector.extract_strided_slice %40 {offsets = [0, 32], sizes = [8, 32], strides = [1, 1]} : vector<8x128xf32> to vector<8x32xf32>
    %43 = arith.mulf %42, %27 : vector<8x32xf32>
    %44 = vector.extract_strided_slice %40 {offsets = [0, 0], sizes = [8, 32], strides = [1, 1]} : vector<8x128xf32> to vector<8x32xf32>
    %45 = vector.extract_strided_slice %41 {offsets = [0, 64], sizes = [8, 32], strides = [1, 1]} : vector<8x128xf32> to vector<8x32xf32>
    %46 = arith.mulf %44, %45 : vector<8x32xf32>
    %47 = arith.addf %43, %46 : vector<8x32xf32>
    %48 = vector.extract_strided_slice %40 {offsets = [0, 96], sizes = [8, 32], strides = [1, 1]} : vector<8x128xf32> to vector<8x32xf32>
    %49 = math.tanh %47 : vector<8x32xf32>
    %50 = arith.mulf %48, %49 : vector<8x32xf32>
    %c8 = arith.constant 8 : index
    %c0_19 = arith.constant 0 : index
    %51 = vector.load %arg12[%c8, %c0_19] : memref<64x32xf32, #tpu.memory_space<vmem>>, vector<8x32xf32>
    tpu.vector_store %arg12[%c8, %c0_19], %50 {strides = array<i32>} : memref<64x32xf32, #tpu.memory_space<vmem>>, vector<8x32xf32>,
    %52 = vector.extract_strided_slice %7 {offsets = [16, 0], sizes = [8, 128], strides = [1, 1]} : vector<64x128xf32> to vector<8x128xf32>
    %53 = arith.truncf %50 : vector<8x32xf32> to vector<8x32xbf16>
    %cst_20 = arith.constant dense<0.000000e+00> : vector<8x128xf32>
    %54 = tpu.matmul %53, %2, %cst_20 {dimension_numbers = #tpu.dot_dimension_numbers<[1], [0], [0], [1], [0, 0, 1, 1], [], []>} : vector<8x32xbf16>, vector<32x128xbf16>, vector<8x128xf32> -> vector<8x128xf32>
    %55 = arith.addf %52, %54 : vector<8x128xf32>
    %56 = arith.negf %55 : vector<8x128xf32>
    %57 = math.exp %56 : vector<8x128xf32>
    %cst_21 = arith.constant 1.000000e+00 : f32
    %58 = vector.broadcast %cst_21 : f32 to vector<8x128xf32>
    %59 = arith.addf %58, %57 : vector<8x128xf32>
    %60 = arith.divf %58, %59 : vector<8x128xf32>
    %61 = math.tanh %55 : vector<8x128xf32>
    %62 = vector.extract_strided_slice %60 {offsets = [0, 32], sizes = [8, 32], strides = [1, 1]} : vector<8x128xf32> to vector<8x32xf32>
    %63 = arith.mulf %62, %47 : vector<8x32xf32>
    %64 = vector.extract_strided_slice %60 {offsets = [0, 0], sizes = [8, 32], strides = [1, 1]} : vector<8x128xf32> to vector<8x32xf32>
    %65 = vector.extract_strided_slice %61 {offsets = [0, 64], sizes = [8, 32], strides = [1, 1]} : vector<8x128xf32> to vector<8x32xf32>
    %66 = arith.mulf %64, %65 : vector<8x32xf32>
    %67 = arith.addf %63, %66 : vector<8x32xf32>
    %68 = vector.extract_strided_slice %60 {offsets = [0, 96], sizes = [8, 32], strides = [1, 1]} : vector<8x128xf32> to vector<8x32xf32>
    %69 = math.tanh %67 : vector<8x32xf32>
    %70 = arith.mulf %68, %69 : vector<8x32xf32>
    %c16 = arith.constant 16 : index
    %c0_22 = arith.constant 0 : index
    %71 = vector.load %arg12[%c16, %c0_22] : memref<64x32xf32, #tpu.memory_space<vmem>>, vector<8x32xf32>
    tpu.vector_store %arg12[%c16, %c0_22], %70 {strides = array<i32>} : memref<64x32xf32, #tpu.memory_space<vmem>>, vector<8x32xf32>,
    %72 = vector.extract_strided_slice %7 {offsets = [24, 0], sizes = [8, 128], strides = [1, 1]} : vector<64x128xf32> to vector<8x128xf32>
    %73 = arith.truncf %70 : vector<8x32xf32> to vector<8x32xbf16>
    %cst_23 = arith.constant dense<0.000000e+00> : vector<8x128xf32>
    %74 = tpu.matmul %73, %2, %cst_23 {dimension_numbers = #tpu.dot_dimension_numbers<[1], [0], [0], [1], [0, 0, 1, 1], [], []>} : vector<8x32xbf16>, vector<32x128xbf16>, vector<8x128xf32> -> vector<8x128xf32>
    %75 = arith.addf %72, %74 : vector<8x128xf32>
    %76 = arith.negf %75 : vector<8x128xf32>
    %77 = math.exp %76 : vector<8x128xf32>
    %cst_24 = arith.constant 1.000000e+00 : f32
    %78 = vector.broadcast %cst_24 : f32 to vector<8x128xf32>
    %79 = arith.addf %78, %77 : vector<8x128xf32>
    %80 = arith.divf %78, %79 : vector<8x128xf32>
    %81 = math.tanh %75 : vector<8x128xf32>
    %82 = vector.extract_strided_slice %80 {offsets = [0, 32], sizes = [8, 32], strides = [1, 1]} : vector<8x128xf32> to vector<8x32xf32>
    %83 = arith.mulf %82, %67 : vector<8x32xf32>
    %84 = vector.extract_strided_slice %80 {offsets = [0, 0], sizes = [8, 32], strides = [1, 1]} : vector<8x128xf32> to vector<8x32xf32>
    %85 = vector.extract_strided_slice %81 {offsets = [0, 64], sizes = [8, 32], strides = [1, 1]} : vector<8x128xf32> to vector<8x32xf32>
    %86 = arith.mulf %84, %85 : vector<8x32xf32>
    %87 = arith.addf %83, %86 : vector<8x32xf32>
    %88 = vector.extract_strided_slice %80 {offsets = [0, 96], sizes = [8, 32], strides = [1, 1]} : vector<8x128xf32> to vector<8x32xf32>
    %89 = math.tanh %87 : vector<8x32xf32>
    %90 = arith.mulf %88, %89 : vector<8x32xf32>
    %c24 = arith.constant 24 : index
    %c0_25 = arith.constant 0 : index
    %91 = vector.load %arg12[%c24, %c0_25] : memref<64x32xf32, #tpu.memory_space<vmem>>, vector<8x32xf32>
    tpu.vector_store %arg12[%c24, %c0_25], %90 {strides = array<i32>} : memref<64x32xf32, #tpu.memory_space<vmem>>, vector<8x32xf32>,
    %92 = vector.extract_strided_slice %7 {offsets = [32, 0], sizes = [8, 128], strides = [1, 1]} : vector<64x128xf32> to vector<8x128xf32>
    %93 = arith.truncf %90 : vector<8x32xf32> to vector<8x32xbf16>
    %cst_26 = arith.constant dense<0.000000e+00> : vector<8x128xf32>
    %94 = tpu.matmul %93, %2, %cst_26 {dimension_numbers = #tpu.dot_dimension_numbers<[1], [0], [0], [1], [0, 0, 1, 1], [], []>} : vector<8x32xbf16>, vector<32x128xbf16>, vector<8x128xf32> -> vector<8x128xf32>
    %95 = arith.addf %92, %94 : vector<8x128xf32>
    %96 = arith.negf %95 : vector<8x128xf32>
    %97 = math.exp %96 : vector<8x128xf32>
    %cst_27 = arith.constant 1.000000e+00 : f32
    %98 = vector.broadcast %cst_27 : f32 to vector<8x128xf32>
    %99 = arith.addf %98, %97 : vector<8x128xf32>
    %100 = arith.divf %98, %99 : vector<8x128xf32>
    %101 = math.tanh %95 : vector<8x128xf32>
    %102 = vector.extract_strided_slice %100 {offsets = [0, 32], sizes = [8, 32], strides = [1, 1]} : vector<8x128xf32> to vector<8x32xf32>
    %103 = arith.mulf %102, %87 : vector<8x32xf32>
    %104 = vector.extract_strided_slice %100 {offsets = [0, 0], sizes = [8, 32], strides = [1, 1]} : vector<8x128xf32> to vector<8x32xf32>
    %105 = vector.extract_strided_slice %101 {offsets = [0, 64], sizes = [8, 32], strides = [1, 1]} : vector<8x128xf32> to vector<8x32xf32>
    %106 = arith.mulf %104, %105 : vector<8x32xf32>
    %107 = arith.addf %103, %106 : vector<8x32xf32>
    %108 = vector.extract_strided_slice %100 {offsets = [0, 96], sizes = [8, 32], strides = [1, 1]} : vector<8x128xf32> to vector<8x32xf32>
    %109 = math.tanh %107 : vector<8x32xf32>
    %110 = arith.mulf %108, %109 : vector<8x32xf32>
    %c32 = arith.constant 32 : index
    %c0_28 = arith.constant 0 : index
    %111 = vector.load %arg12[%c32, %c0_28] : memref<64x32xf32, #tpu.memory_space<vmem>>, vector<8x32xf32>
    tpu.vector_store %arg12[%c32, %c0_28], %110 {strides = array<i32>} : memref<64x32xf32, #tpu.memory_space<vmem>>, vector<8x32xf32>,
    %112 = vector.extract_strided_slice %7 {offsets = [40, 0], sizes = [8, 128], strides = [1, 1]} : vector<64x128xf32> to vector<8x128xf32>
    %113 = arith.truncf %110 : vector<8x32xf32> to vector<8x32xbf16>
    %cst_29 = arith.constant dense<0.000000e+00> : vector<8x128xf32>
    %114 = tpu.matmul %113, %2, %cst_29 {dimension_numbers = #tpu.dot_dimension_numbers<[1], [0], [0], [1], [0, 0, 1, 1], [], []>} : vector<8x32xbf16>, vector<32x128xbf16>, vector<8x128xf32> -> vector<8x128xf32>
    %115 = arith.addf %112, %114 : vector<8x128xf32>
    %116 = arith.negf %115 : vector<8x128xf32>
    %117 = math.exp %116 : vector<8x128xf32>
    %cst_30 = arith.constant 1.000000e+00 : f32
    %118 = vector.broadcast %cst_30 : f32 to vector<8x128xf32>
    %119 = arith.addf %118, %117 : vector<8x128xf32>
    %120 = arith.divf %118, %119 : vector<8x128xf32>
    %121 = math.tanh %115 : vector<8x128xf32>
    %122 = vector.extract_strided_slice %120 {offsets = [0, 32], sizes = [8, 32], strides = [1, 1]} : vector<8x128xf32> to vector<8x32xf32>
    %123 = arith.mulf %122, %107 : vector<8x32xf32>
    %124 = vector.extract_strided_slice %120 {offsets = [0, 0], sizes = [8, 32], strides = [1, 1]} : vector<8x128xf32> to vector<8x32xf32>
    %125 = vector.extract_strided_slice %121 {offsets = [0, 64], sizes = [8, 32], strides = [1, 1]} : vector<8x128xf32> to vector<8x32xf32>
    %126 = arith.mulf %124, %125 : vector<8x32xf32>
    %127 = arith.addf %123, %126 : vector<8x32xf32>
    %128 = vector.extract_strided_slice %120 {offsets = [0, 96], sizes = [8, 32], strides = [1, 1]} : vector<8x128xf32> to vector<8x32xf32>
    %129 = math.tanh %127 : vector<8x32xf32>
    %130 = arith.mulf %128, %129 : vector<8x32xf32>
    %c40 = arith.constant 40 : index
    %c0_31 = arith.constant 0 : index
    %131 = vector.load %arg12[%c40, %c0_31] : memref<64x32xf32, #tpu.memory_space<vmem>>, vector<8x32xf32>
    tpu.vector_store %arg12[%c40, %c0_31], %130 {strides = array<i32>} : memref<64x32xf32, #tpu.memory_space<vmem>>, vector<8x32xf32>,
    %132 = vector.extract_strided_slice %7 {offsets = [48, 0], sizes = [8, 128], strides = [1, 1]} : vector<64x128xf32> to vector<8x128xf32>
    %133 = arith.truncf %130 : vector<8x32xf32> to vector<8x32xbf16>
    %cst_32 = arith.constant dense<0.000000e+00> : vector<8x128xf32>
    %134 = tpu.matmul %133, %2, %cst_32 {dimension_numbers = #tpu.dot_dimension_numbers<[1], [0], [0], [1], [0, 0, 1, 1], [], []>} : vector<8x32xbf16>, vector<32x128xbf16>, vector<8x128xf32> -> vector<8x128xf32>
    %135 = arith.addf %132, %134 : vector<8x128xf32>
    %136 = arith.negf %135 : vector<8x128xf32>
    %137 = math.exp %136 : vector<8x128xf32>
    %cst_33 = arith.constant 1.000000e+00 : f32
    %138 = vector.broadcast %cst_33 : f32 to vector<8x128xf32>
    %139 = arith.addf %138, %137 : vector<8x128xf32>
    %140 = arith.divf %138, %139 : vector<8x128xf32>
    %141 = math.tanh %135 : vector<8x128xf32>
    %142 = vector.extract_strided_slice %140 {offsets = [0, 32], sizes = [8, 32], strides = [1, 1]} : vector<8x128xf32> to vector<8x32xf32>
    %143 = arith.mulf %142, %127 : vector<8x32xf32>
    %144 = vector.extract_strided_slice %140 {offsets = [0, 0], sizes = [8, 32], strides = [1, 1]} : vector<8x128xf32> to vector<8x32xf32>
    %145 = vector.extract_strided_slice %141 {offsets = [0, 64], sizes = [8, 32], strides = [1, 1]} : vector<8x128xf32> to vector<8x32xf32>
    %146 = arith.mulf %144, %145 : vector<8x32xf32>
    %147 = arith.addf %143, %146 : vector<8x32xf32>
    %148 = vector.extract_strided_slice %140 {offsets = [0, 96], sizes = [8, 32], strides = [1, 1]} : vector<8x128xf32> to vector<8x32xf32>
    %149 = math.tanh %147 : vector<8x32xf32>
    %150 = arith.mulf %148, %149 : vector<8x32xf32>
    %c48 = arith.constant 48 : index
    %c0_34 = arith.constant 0 : index
    %151 = vector.load %arg12[%c48, %c0_34] : memref<64x32xf32, #tpu.memory_space<vmem>>, vector<8x32xf32>
    tpu.vector_store %arg12[%c48, %c0_34], %150 {strides = array<i32>} : memref<64x32xf32, #tpu.memory_space<vmem>>, vector<8x32xf32>,
    %152 = vector.extract_strided_slice %7 {offsets = [56, 0], sizes = [8, 128], strides = [1, 1]} : vector<64x128xf32> to vector<8x128xf32>
    %153 = arith.truncf %150 : vector<8x32xf32> to vector<8x32xbf16>
    %cst_35 = arith.constant dense<0.000000e+00> : vector<8x128xf32>
    %154 = tpu.matmul %153, %2, %cst_35 {dimension_numbers = #tpu.dot_dimension_numbers<[1], [0], [0], [1], [0, 0, 1, 1], [], []>} : vector<8x32xbf16>, vector<32x128xbf16>, vector<8x128xf32> -> vector<8x128xf32>
    %155 = arith.addf %152, %154 : vector<8x128xf32>
    %156 = arith.negf %155 : vector<8x128xf32>
    %157 = math.exp %156 : vector<8x128xf32>
    %cst_36 = arith.constant 1.000000e+00 : f32
    %158 = vector.broadcast %cst_36 : f32 to vector<8x128xf32>
    %159 = arith.addf %158, %157 : vector<8x128xf32>
    %160 = arith.divf %158, %159 : vector<8x128xf32>
    %161 = math.tanh %155 : vector<8x128xf32>
    %162 = vector.extract_strided_slice %160 {offsets = [0, 32], sizes = [8, 32], strides = [1, 1]} : vector<8x128xf32> to vector<8x32xf32>
    %163 = arith.mulf %162, %147 : vector<8x32xf32>
    %164 = vector.extract_strided_slice %160 {offsets = [0, 0], sizes = [8, 32], strides = [1, 1]} : vector<8x128xf32> to vector<8x32xf32>
    %165 = vector.extract_strided_slice %161 {offsets = [0, 64], sizes = [8, 32], strides = [1, 1]} : vector<8x128xf32> to vector<8x32xf32>
    %166 = arith.mulf %164, %165 : vector<8x32xf32>
    %167 = arith.addf %163, %166 : vector<8x32xf32>
    %168 = vector.extract_strided_slice %160 {offsets = [0, 96], sizes = [8, 32], strides = [1, 1]} : vector<8x128xf32> to vector<8x32xf32>
    %169 = math.tanh %167 : vector<8x32xf32>
    %170 = arith.mulf %168, %169 : vector<8x32xf32>
    %c56 = arith.constant 56 : index
    %c0_37 = arith.constant 0 : index
    %171 = vector.load %arg12[%c56, %c0_37] : memref<64x32xf32, #tpu.memory_space<vmem>>, vector<8x32xf32>
    tpu.vector_store %arg12[%c56, %c0_37], %170 {strides = array<i32>} : memref<64x32xf32, #tpu.memory_space<vmem>>, vector<8x32xf32>,
    %c0_38 = arith.constant 0 : index
    %c0_39 = arith.constant 0 : index
    %172 = vector.load %arg12[%c0_38, %c0_39] : memref<64x32xf32, #tpu.memory_space<vmem>>, vector<64x32xf32>
    %c0_40 = arith.constant 0 : index
    %c0_41 = arith.constant 0 : index
    %173 = vector.load %arg4[%c0_40, %c0_41] : memref<32x128xbf16, #tpu.memory_space<vmem>>, vector<32x128xbf16>
    %c0_42 = arith.constant 0 : index
    %c0_43 = arith.constant 0 : index
    %174 = vector.load %arg5[%c0_42, %c0_43] : memref<32x128xbf16, #tpu.memory_space<vmem>>, vector<32x128xbf16>
    %175 = arith.truncf %172 : vector<64x32xf32> to vector<64x32xbf16>
    %cst_44 = arith.constant dense<0.000000e+00> : vector<64x128xf32>
    %176 = tpu.matmul %175, %173, %cst_44 {dimension_numbers = #tpu.dot_dimension_numbers<[1], [0], [0], [1], [0, 0, 1, 1], [], []>} : vector<64x32xbf16>, vector<32x128xbf16>, vector<64x128xf32> -> vector<64x128xf32>
    %c0_45 = arith.constant 0 : index
    %c0_46 = arith.constant 0 : index
    %177 = vector.load %arg6[%c0_45, %c0_46] : memref<1x128xf32, #tpu.memory_space<vmem>>, vector<1x128xf32>
    %178 = vector.broadcast %177 : vector<1x128xf32> to vector<64x128xf32>
    %179 = arith.addf %176, %178 : vector<64x128xf32>
    %c1 = arith.constant 1 : index
    %c0_47 = arith.constant 0 : index
    %c0_48 = arith.constant 0 : index
    %180 = vector.load %arg7[%c1, %c0_47, %c0_48] : memref<2x8x32xf32, #tpu.memory_space<vmem>>, vector<1x8x32xf32>
    %181 = vector.shape_cast %180 : vector<1x8x32xf32> to vector<8x32xf32>
    %c1_49 = arith.constant 1 : index
    %c0_50 = arith.constant 0 : index
    %c0_51 = arith.constant 0 : index
    %182 = vector.load %arg8[%c1_49, %c0_50, %c0_51] : memref<2x8x32xf32, #tpu.memory_space<vmem>>, vector<1x8x32xf32>
    %183 = vector.shape_cast %182 : vector<1x8x32xf32> to vector<8x32xf32>
    %184 = vector.extract_strided_slice %179 {offsets = [0, 0], sizes = [8, 128], strides = [1, 1]} : vector<64x128xf32> to vector<8x128xf32>
    %185 = arith.truncf %181 : vector<8x32xf32> to vector<8x32xbf16>
    %cst_52 = arith.constant dense<0.000000e+00> : vector<8x128xf32>
    %186 = tpu.matmul %185, %174, %cst_52 {dimension_numbers = #tpu.dot_dimension_numbers<[1], [0], [0], [1], [0, 0, 1, 1], [], []>} : vector<8x32xbf16>, vector<32x128xbf16>, vector<8x128xf32> -> vector<8x128xf32>
    %187 = arith.addf %184, %186 : vector<8x128xf32>
    %188 = arith.negf %187 : vector<8x128xf32>
    %189 = math.exp %188 : vector<8x128xf32>
    %cst_53 = arith.constant 1.000000e+00 : f32
    %190 = vector.broadcast %cst_53 : f32 to vector<8x128xf32>
    %191 = arith.addf %190, %189 : vector<8x128xf32>
    %192 = arith.divf %190, %191 : vector<8x128xf32>
    %193 = math.tanh %187 : vector<8x128xf32>
    %194 = vector.extract_strided_slice %192 {offsets = [0, 32], sizes = [8, 32], strides = [1, 1]} : vector<8x128xf32> to vector<8x32xf32>
    %195 = arith.mulf %194, %183 : vector<8x32xf32>
    %196 = vector.extract_strided_slice %192 {offsets = [0, 0], sizes = [8, 32], strides = [1, 1]} : vector<8x128xf32> to vector<8x32xf32>
    %197 = vector.extract_strided_slice %193 {offsets = [0, 64], sizes = [8, 32], strides = [1, 1]} : vector<8x128xf32> to vector<8x32xf32>
    %198 = arith.mulf %196, %197 : vector<8x32xf32>
    %199 = arith.addf %195, %198 : vector<8x32xf32>
    %200 = vector.extract_strided_slice %192 {offsets = [0, 96], sizes = [8, 32], strides = [1, 1]} : vector<8x128xf32> to vector<8x32xf32>
    %201 = math.tanh %199 : vector<8x32xf32>
    %202 = arith.mulf %200, %201 : vector<8x32xf32>
    %203 = vector.extract_strided_slice %179 {offsets = [8, 0], sizes = [8, 128], strides = [1, 1]} : vector<64x128xf32> to vector<8x128xf32>
    %204 = arith.truncf %202 : vector<8x32xf32> to vector<8x32xbf16>
    %cst_54 = arith.constant dense<0.000000e+00> : vector<8x128xf32>
    %205 = tpu.matmul %204, %174, %cst_54 {dimension_numbers = #tpu.dot_dimension_numbers<[1], [0], [0], [1], [0, 0, 1, 1], [], []>} : vector<8x32xbf16>, vector<32x128xbf16>, vector<8x128xf32> -> vector<8x128xf32>
    %206 = arith.addf %203, %205 : vector<8x128xf32>
    %207 = arith.negf %206 : vector<8x128xf32>
    %208 = math.exp %207 : vector<8x128xf32>
    %cst_55 = arith.constant 1.000000e+00 : f32
    %209 = vector.broadcast %cst_55 : f32 to vector<8x128xf32>
    %210 = arith.addf %209, %208 : vector<8x128xf32>
    %211 = arith.divf %209, %210 : vector<8x128xf32>
    %212 = math.tanh %206 : vector<8x128xf32>
    %213 = vector.extract_strided_slice %211 {offsets = [0, 32], sizes = [8, 32], strides = [1, 1]} : vector<8x128xf32> to vector<8x32xf32>
    %214 = arith.mulf %213, %199 : vector<8x32xf32>
    %215 = vector.extract_strided_slice %211 {offsets = [0, 0], sizes = [8, 32], strides = [1, 1]} : vector<8x128xf32> to vector<8x32xf32>
    %216 = vector.extract_strided_slice %212 {offsets = [0, 64], sizes = [8, 32], strides = [1, 1]} : vector<8x128xf32> to vector<8x32xf32>
    %217 = arith.mulf %215, %216 : vector<8x32xf32>
    %218 = arith.addf %214, %217 : vector<8x32xf32>
    %219 = vector.extract_strided_slice %211 {offsets = [0, 96], sizes = [8, 32], strides = [1, 1]} : vector<8x128xf32> to vector<8x32xf32>
    %220 = math.tanh %218 : vector<8x32xf32>
    %221 = arith.mulf %219, %220 : vector<8x32xf32>
    %222 = vector.extract_strided_slice %179 {offsets = [16, 0], sizes = [8, 128], strides = [1, 1]} : vector<64x128xf32> to vector<8x128xf32>
    %223 = arith.truncf %221 : vector<8x32xf32> to vector<8x32xbf16>
    %cst_56 = arith.constant dense<0.000000e+00> : vector<8x128xf32>
    %224 = tpu.matmul %223, %174, %cst_56 {dimension_numbers = #tpu.dot_dimension_numbers<[1], [0], [0], [1], [0, 0, 1, 1], [], []>} : vector<8x32xbf16>, vector<32x128xbf16>, vector<8x128xf32> -> vector<8x128xf32>
    %225 = arith.addf %222, %224 : vector<8x128xf32>
    %226 = arith.negf %225 : vector<8x128xf32>
    %227 = math.exp %226 : vector<8x128xf32>
    %cst_57 = arith.constant 1.000000e+00 : f32
    %228 = vector.broadcast %cst_57 : f32 to vector<8x128xf32>
    %229 = arith.addf %228, %227 : vector<8x128xf32>
    %230 = arith.divf %228, %229 : vector<8x128xf32>
    %231 = math.tanh %225 : vector<8x128xf32>
    %232 = vector.extract_strided_slice %230 {offsets = [0, 32], sizes = [8, 32], strides = [1, 1]} : vector<8x128xf32> to vector<8x32xf32>
    %233 = arith.mulf %232, %218 : vector<8x32xf32>
    %234 = vector.extract_strided_slice %230 {offsets = [0, 0], sizes = [8, 32], strides = [1, 1]} : vector<8x128xf32> to vector<8x32xf32>
    %235 = vector.extract_strided_slice %231 {offsets = [0, 64], sizes = [8, 32], strides = [1, 1]} : vector<8x128xf32> to vector<8x32xf32>
    %236 = arith.mulf %234, %235 : vector<8x32xf32>
    %237 = arith.addf %233, %236 : vector<8x32xf32>
    %238 = vector.extract_strided_slice %230 {offsets = [0, 96], sizes = [8, 32], strides = [1, 1]} : vector<8x128xf32> to vector<8x32xf32>
    %239 = math.tanh %237 : vector<8x32xf32>
    %240 = arith.mulf %238, %239 : vector<8x32xf32>
    %241 = vector.extract_strided_slice %179 {offsets = [24, 0], sizes = [8, 128], strides = [1, 1]} : vector<64x128xf32> to vector<8x128xf32>
    %242 = arith.truncf %240 : vector<8x32xf32> to vector<8x32xbf16>
    %cst_58 = arith.constant dense<0.000000e+00> : vector<8x128xf32>
    %243 = tpu.matmul %242, %174, %cst_58 {dimension_numbers = #tpu.dot_dimension_numbers<[1], [0], [0], [1], [0, 0, 1, 1], [], []>} : vector<8x32xbf16>, vector<32x128xbf16>, vector<8x128xf32> -> vector<8x128xf32>
    %244 = arith.addf %241, %243 : vector<8x128xf32>
    %245 = arith.negf %244 : vector<8x128xf32>
    %246 = math.exp %245 : vector<8x128xf32>
    %cst_59 = arith.constant 1.000000e+00 : f32
    %247 = vector.broadcast %cst_59 : f32 to vector<8x128xf32>
    %248 = arith.addf %247, %246 : vector<8x128xf32>
    %249 = arith.divf %247, %248 : vector<8x128xf32>
    %250 = math.tanh %244 : vector<8x128xf32>
    %251 = vector.extract_strided_slice %249 {offsets = [0, 32], sizes = [8, 32], strides = [1, 1]} : vector<8x128xf32> to vector<8x32xf32>
    %252 = arith.mulf %251, %237 : vector<8x32xf32>
    %253 = vector.extract_strided_slice %249 {offsets = [0, 0], sizes = [8, 32], strides = [1, 1]} : vector<8x128xf32> to vector<8x32xf32>
    %254 = vector.extract_strided_slice %250 {offsets = [0, 64], sizes = [8, 32], strides = [1, 1]} : vector<8x128xf32> to vector<8x32xf32>
    %255 = arith.mulf %253, %254 : vector<8x32xf32>
    %256 = arith.addf %252, %255 : vector<8x32xf32>
    %257 = vector.extract_strided_slice %249 {offsets = [0, 96], sizes = [8, 32], strides = [1, 1]} : vector<8x128xf32> to vector<8x32xf32>
    %258 = math.tanh %256 : vector<8x32xf32>
    %259 = arith.mulf %257, %258 : vector<8x32xf32>
    %260 = vector.extract_strided_slice %179 {offsets = [32, 0], sizes = [8, 128], strides = [1, 1]} : vector<64x128xf32> to vector<8x128xf32>
    %261 = arith.truncf %259 : vector<8x32xf32> to vector<8x32xbf16>
    %cst_60 = arith.constant dense<0.000000e+00> : vector<8x128xf32>
    %262 = tpu.matmul %261, %174, %cst_60 {dimension_numbers = #tpu.dot_dimension_numbers<[1], [0], [0], [1], [0, 0, 1, 1], [], []>} : vector<8x32xbf16>, vector<32x128xbf16>, vector<8x128xf32> -> vector<8x128xf32>
    %263 = arith.addf %260, %262 : vector<8x128xf32>
    %264 = arith.negf %263 : vector<8x128xf32>
    %265 = math.exp %264 : vector<8x128xf32>
    %cst_61 = arith.constant 1.000000e+00 : f32
    %266 = vector.broadcast %cst_61 : f32 to vector<8x128xf32>
    %267 = arith.addf %266, %265 : vector<8x128xf32>
    %268 = arith.divf %266, %267 : vector<8x128xf32>
    %269 = math.tanh %263 : vector<8x128xf32>
    %270 = vector.extract_strided_slice %268 {offsets = [0, 32], sizes = [8, 32], strides = [1, 1]} : vector<8x128xf32> to vector<8x32xf32>
    %271 = arith.mulf %270, %256 : vector<8x32xf32>
    %272 = vector.extract_strided_slice %268 {offsets = [0, 0], sizes = [8, 32], strides = [1, 1]} : vector<8x128xf32> to vector<8x32xf32>
    %273 = vector.extract_strided_slice %269 {offsets = [0, 64], sizes = [8, 32], strides = [1, 1]} : vector<8x128xf32> to vector<8x32xf32>
    %274 = arith.mulf %272, %273 : vector<8x32xf32>
    %275 = arith.addf %271, %274 : vector<8x32xf32>
    %276 = vector.extract_strided_slice %268 {offsets = [0, 96], sizes = [8, 32], strides = [1, 1]} : vector<8x128xf32> to vector<8x32xf32>
    %277 = math.tanh %275 : vector<8x32xf32>
    %278 = arith.mulf %276, %277 : vector<8x32xf32>
    %279 = vector.extract_strided_slice %179 {offsets = [40, 0], sizes = [8, 128], strides = [1, 1]} : vector<64x128xf32> to vector<8x128xf32>
    %280 = arith.truncf %278 : vector<8x32xf32> to vector<8x32xbf16>
    %cst_62 = arith.constant dense<0.000000e+00> : vector<8x128xf32>
    %281 = tpu.matmul %280, %174, %cst_62 {dimension_numbers = #tpu.dot_dimension_numbers<[1], [0], [0], [1], [0, 0, 1, 1], [], []>} : vector<8x32xbf16>, vector<32x128xbf16>, vector<8x128xf32> -> vector<8x128xf32>
    %282 = arith.addf %279, %281 : vector<8x128xf32>
    %283 = arith.negf %282 : vector<8x128xf32>
    %284 = math.exp %283 : vector<8x128xf32>
    %cst_63 = arith.constant 1.000000e+00 : f32
    %285 = vector.broadcast %cst_63 : f32 to vector<8x128xf32>
    %286 = arith.addf %285, %284 : vector<8x128xf32>
    %287 = arith.divf %285, %286 : vector<8x128xf32>
    %288 = math.tanh %282 : vector<8x128xf32>
    %289 = vector.extract_strided_slice %287 {offsets = [0, 32], sizes = [8, 32], strides = [1, 1]} : vector<8x128xf32> to vector<8x32xf32>
    %290 = arith.mulf %289, %275 : vector<8x32xf32>
    %291 = vector.extract_strided_slice %287 {offsets = [0, 0], sizes = [8, 32], strides = [1, 1]} : vector<8x128xf32> to vector<8x32xf32>
    %292 = vector.extract_strided_slice %288 {offsets = [0, 64], sizes = [8, 32], strides = [1, 1]} : vector<8x128xf32> to vector<8x32xf32>
    %293 = arith.mulf %291, %292 : vector<8x32xf32>
    %294 = arith.addf %290, %293 : vector<8x32xf32>
    %295 = vector.extract_strided_slice %287 {offsets = [0, 96], sizes = [8, 32], strides = [1, 1]} : vector<8x128xf32> to vector<8x32xf32>
    %296 = math.tanh %294 : vector<8x32xf32>
    %297 = arith.mulf %295, %296 : vector<8x32xf32>
    %298 = vector.extract_strided_slice %179 {offsets = [48, 0], sizes = [8, 128], strides = [1, 1]} : vector<64x128xf32> to vector<8x128xf32>
    %299 = arith.truncf %297 : vector<8x32xf32> to vector<8x32xbf16>
    %cst_64 = arith.constant dense<0.000000e+00> : vector<8x128xf32>
    %300 = tpu.matmul %299, %174, %cst_64 {dimension_numbers = #tpu.dot_dimension_numbers<[1], [0], [0], [1], [0, 0, 1, 1], [], []>} : vector<8x32xbf16>, vector<32x128xbf16>, vector<8x128xf32> -> vector<8x128xf32>
    %301 = arith.addf %298, %300 : vector<8x128xf32>
    %302 = arith.negf %301 : vector<8x128xf32>
    %303 = math.exp %302 : vector<8x128xf32>
    %cst_65 = arith.constant 1.000000e+00 : f32
    %304 = vector.broadcast %cst_65 : f32 to vector<8x128xf32>
    %305 = arith.addf %304, %303 : vector<8x128xf32>
    %306 = arith.divf %304, %305 : vector<8x128xf32>
    %307 = math.tanh %301 : vector<8x128xf32>
    %308 = vector.extract_strided_slice %306 {offsets = [0, 32], sizes = [8, 32], strides = [1, 1]} : vector<8x128xf32> to vector<8x32xf32>
    %309 = arith.mulf %308, %294 : vector<8x32xf32>
    %310 = vector.extract_strided_slice %306 {offsets = [0, 0], sizes = [8, 32], strides = [1, 1]} : vector<8x128xf32> to vector<8x32xf32>
    %311 = vector.extract_strided_slice %307 {offsets = [0, 64], sizes = [8, 32], strides = [1, 1]} : vector<8x128xf32> to vector<8x32xf32>
    %312 = arith.mulf %310, %311 : vector<8x32xf32>
    %313 = arith.addf %309, %312 : vector<8x32xf32>
    %314 = vector.extract_strided_slice %306 {offsets = [0, 96], sizes = [8, 32], strides = [1, 1]} : vector<8x128xf32> to vector<8x32xf32>
    %315 = math.tanh %313 : vector<8x32xf32>
    %316 = arith.mulf %314, %315 : vector<8x32xf32>
    %317 = vector.extract_strided_slice %179 {offsets = [56, 0], sizes = [8, 128], strides = [1, 1]} : vector<64x128xf32> to vector<8x128xf32>
    %318 = arith.truncf %316 : vector<8x32xf32> to vector<8x32xbf16>
    %cst_66 = arith.constant dense<0.000000e+00> : vector<8x128xf32>
    %319 = tpu.matmul %318, %174, %cst_66 {dimension_numbers = #tpu.dot_dimension_numbers<[1], [0], [0], [1], [0, 0, 1, 1], [], []>} : vector<8x32xbf16>, vector<32x128xbf16>, vector<8x128xf32> -> vector<8x128xf32>
    %320 = arith.addf %317, %319 : vector<8x128xf32>
    %321 = arith.negf %320 : vector<8x128xf32>
    %322 = math.exp %321 : vector<8x128xf32>
    %cst_67 = arith.constant 1.000000e+00 : f32
    %323 = vector.broadcast %cst_67 : f32 to vector<8x128xf32>
    %324 = arith.addf %323, %322 : vector<8x128xf32>
    %325 = arith.divf %323, %324 : vector<8x128xf32>
    %326 = math.tanh %320 : vector<8x128xf32>
    %327 = vector.extract_strided_slice %325 {offsets = [0, 32], sizes = [8, 32], strides = [1, 1]} : vector<8x128xf32> to vector<8x32xf32>
    %328 = arith.mulf %327, %313 : vector<8x32xf32>
    %329 = vector.extract_strided_slice %325 {offsets = [0, 0], sizes = [8, 32], strides = [1, 1]} : vector<8x128xf32> to vector<8x32xf32>
    %330 = vector.extract_strided_slice %326 {offsets = [0, 64], sizes = [8, 32], strides = [1, 1]} : vector<8x128xf32> to vector<8x32xf32>
    %331 = arith.mulf %329, %330 : vector<8x32xf32>
    %332 = arith.addf %328, %331 : vector<8x32xf32>
    %333 = vector.extract_strided_slice %325 {offsets = [0, 96], sizes = [8, 32], strides = [1, 1]} : vector<8x128xf32> to vector<8x32xf32>
    %334 = math.tanh %332 : vector<8x32xf32>
    %335 = arith.mulf %333, %334 : vector<8x32xf32>
    %336 = vector.extract_strided_slice %335 {offsets = [3, 0], sizes = [1, 32], strides = [1, 1]} : vector<8x32xf32> to vector<1x32xf32>
    %c0_68 = arith.constant 0 : index
    %c0_69 = arith.constant 0 : index
    %337 = vector.load %arg9[%c0_68, %c0_69] : memref<32x16xf32, #tpu.memory_space<vmem>>, vector<32x16xf32>
    %cst_70 = arith.constant dense<0.000000e+00> : vector<1x16xf32>
    %338 = tpu.matmul %336, %337, %cst_70 {dimension_numbers = #tpu.dot_dimension_numbers<[1], [0], [0], [1], [0, 0, 1, 1], [], []>} : vector<1x32xf32>, vector<32x16xf32>, vector<1x16xf32> -> vector<1x16xf32>
    %c0_71 = arith.constant 0 : index
    %c0_72 = arith.constant 0 : index
    %339 = vector.load %arg10[%c0_71, %c0_72] : memref<1x16xf32, #tpu.memory_space<vmem>>, vector<1x16xf32>
    %340 = arith.addf %338, %339 : vector<1x16xf32>
    %c0_73 = arith.constant 0 : index
    %c0_74 = arith.constant 0 : index
    %341 = vector.load %arg11[%c0_73, %c0_74] : memref<1x16xf32, #tpu.memory_space<vmem>>, vector<1x16xf32>
    tpu.vector_store %arg11[%c0_73, %c0_74], %340 {strides = array<i32>} : memref<1x16xf32, #tpu.memory_space<vmem>>, vector<1x16xf32>,
    return
  }
}

</mosaic_0001>

<bundles_post_ra>
// kernel: _lambda_.1
= control target key start
LH: loop header
LB: loop body
LE: loop exit
PB: predicated region body
PF: predicated region fallthrough
CT: control target
= control target key end

     0   :  { %vm75_vm0 = vcmask 261120   ;;  %s1447_s12 = smov 64   ;;  %s1448_s15 = smov 32   ;;  %s1814_s1 = inlined_call_operand.vmem [shape: bf16[32,128], index: 1, kind: input, shape index: {}]   ;;  %s1815_s2 = inlined_call_operand.vmem [shape: bf16[32,128], index: 2, kind: input, shape index: {}]   ;;  %s1816_s0 = inlined_call_operand.vmem [shape: f32[64,32], index: 0, kind: input, shape index: {}]   ;;  %s1817_s7 = inlined_call_operand.vmem [shape: f32[2,8,32], index: 7, kind: input, shape index: {}]   ;;  %s1818_s3 = inlined_call_operand.vmem [shape: f32[1,128], index: 3, kind: input, shape index: {}]   ;;  %s1819_s8 = inlined_call_operand.vmem [shape: f32[2,8,32], index: 8, kind: input, shape index: {}]   ;;  %s1820_s4 = inlined_call_operand.vmem [shape: bf16[32,128], index: 4, kind: input, shape index: {}]   ;;  %s1821_s6 = inlined_call_operand.vmem [shape: f32[1,128], index: 6, kind: input, shape index: {}]   ;;  %s1822_s5 = inlined_call_operand.vmem [shape: bf16[32,128], index: 5, kind: input, shape index: {}]   ;;  %s1823_s9 = inlined_call_operand.vmem [shape: f32[32,16], index: 9, kind: input, shape index: {}]   ;;  %s1824_s10 = inlined_call_operand.vmem [shape: f32[1,16], index: 10, kind: input, shape index: {}]   ;;  %s1825_s11 = inlined_call_operand.vmem [shape: f32[1,16], index: 11, kind: output, shape index: {}]  }
   0x1   :  { %v1307_v0 = vld [vmem:[%s1814_s1 + $0x8] sm:$0xff]  ;;  %v1306_v2 = vld [vmem:[%s1814_s1] sm:$0xff] }
   0x2   :  { %v1515_v1 = vld [vmem:[%s1815_s2 + $0x8] sm:$0xff]  ;;  %v1523_v3 = vld [vmem:[%s1815_s2] sm:$0xff]  ;;  %94 = vmatpush.bf16.msra.mxu0 %v1307_v0 }
   0x3   :  { %v39_v4 = vld [vmem:[%s1816_s0] sm:$0xff]  ;;  %141 = vmatpush.bf16.msra.mxu1 %v1515_v1  ;;  %v40_v5 = vld [vmem:[%s1816_s0 + $0x8] sm:$0xff]  ;;  %208 = vmatpush.bf16.msra.mxu2 %v1515_v1 }
   0x4   :  { %v117_v6 = vld [vmem:[%s1817_s7] sm:$0xff]  ;;  %271 = vmatpush.bf16.msra.mxu3 %v1515_v1  ;;  %v55_v7 = vpack.c.bf16 %v40_v5, %v39_v4 }
   0x5   :  { %v119_v8 = vpack.c.bf16 %v117_v6, %v117_v6  ;;  %v1553_v9 = vld [vmem:[%s1818_s3] ss:$0 sm:$0xff] }
   0x6   :  { %95 = vmatpush.bf16.msra.mxu0 %v1306_v2  ;;  %v118_v16 = vld [vmem:[%s1819_s8] sm:$0xff]  ;;  %v41_v2 = vld [vmem:[%s1816_s0 + $0x10] sm:$0xff] }
   0x7   :  { %142 = vmatpush.bf16.msra.mxu1 %v1523_v3  ;;  %209 = vmatpush.bf16.msra.mxu2 %v1523_v3 }
   0x8   :  { %272 = vmatpush.bf16.msra.mxu3 %v1523_v3 }
   0x9   :  { %1239 = vmatmul.msk.bf16.vlgmr.msra.gmra.mxu0 %vm75_vm0, %v55_v7 }
   0xa   :  { %1251 = vmatmul.msk.bf16.vlgmr.msra.gmra.mxu1 %vm75_vm0, %v119_v8 }
   0xb   :  { %334 = vmatpush.bf16.msrb.mxu1 %v1515_v1  ;;  %397 = vmatpush.bf16.msrb.mxu2 %v1515_v1 }
   0xc   :  { %460 = vmatpush.bf16.msrb.mxu3 %v1515_v1 }
   0xf   :  { %335 = vmatpush.bf16.msrb.mxu1 %v1523_v3  ;;  %398 = vmatpush.bf16.msrb.mxu2 %v1523_v3 }
  0x10   :  { %461 = vmatpush.bf16.msrb.mxu3 %v1523_v3 }
  0x13   :  { %523 = vmatpush.bf16.msra.mxu1 %v1515_v1 }
  0x17   :  { %524 = vmatpush.bf16.msra.mxu1 %v1523_v3 }
  0x86   :  { %v97_v10 = vpop.f32.mrf.mxu0 }
  0x87   :  { %v144_v11 = vpop.f32.mrf.mxu1  ;;  %v98_v12 = vadd.f32 %v1553_v9, %v97_v10 }
  0x89   :  { %v148_v13 = vadd.f32 %v144_v11, %v98_v12 }
  0x8b   :  { %1318 = vtanh.f32 %v148_v13  ;;  %v1252_v17 = vmul.f32 -1.442695, %v148_v13 }
  0x8d   :  { %1320 = vpow2.f32 %v1252_v17 }
  0x8e   :  { %v99_v41 = vpop.f32.mrf.mxu0 }
  0x8f   :  { %v146_v14 = vpop.f32.mrf.mxu1  ;;  %v100_v42 = vadd.f32 %v1553_v9, %v99_v41 }
  0x91   :  { %v1319_v15 = vpop.eup %1318 }
  0x92   :  { %175 = vrot.lane.b32.xlu0 %v1319_v15, %s1447_s12 }
  0x93   :  { %v1321_v18 = vpop.eup %1320 }
  0x94   :  { %v152_v19 = vadd.f32 1.0, %v1321_v18 }
  0x96   :  { %1322 = vrcp.f32 %v152_v19  ;;  %v164_v25 = vand.u32 2147483648, %v152_v19  ;;  %vm158_vm2 = vweird.f32 %v152_v19  ;;  %v162_v26 = vand.u32 2147483647, %v152_v19 }
  0x98   :  { %v165_v28 = vor.u32 1.1754944e-38, %v164_v25  ;;  %vm163_vm4 = vcmp.eq.f32.partialorder %v162_v26, 8.507059e+37 }
  0x9a   :  { %170 = vrot.lane.b32.xlu0 %v118_v16, %s1448_s15 }
  0x9c   :  { %v1323_v20 = vpop.eup %1322 }
  0x9d   :  { %v154_v21 = vmul.f32 %v1323_v20, %v152_v19  ;;  %vm159_vm1 = vweird.f32 %v1323_v20 }
  0x9e   :  { %vm160_vm3 = vmor %vm158_vm2, %vm159_vm1 }
  0x9f   :  { %v155_v22 = vsub.f32 1.0, %v154_v21 }
  0xa1   :  { %v156_v23 = vmul.f32 %v1323_v20, %v155_v22 }
  0xa3   :  { %v157_v24 = vadd.f32 %v1323_v20, %v156_v23 }
  0xa5   :  { %v161_v27 = vsel %vm160_vm3, %v1323_v20, %v157_v24 }
  0xa6   :  { %v166_v30 = vsel %vm163_vm4, %v165_v28, %v161_v27 }
 0x104   :  { %v176_v29 = vpop.permute.xlu0 %175 }
 0x105   :  { %v178_v31 = vmul.f32 %v176_v29, %v166_v30 }
 0x107   :  { %180 = vrot.lane.b32.xlu1 %v178_v31, %s1448_s15 }
 0x10c   :  { %v171_v32 = vpop.permute.xlu0 %170 }
 0x10d   :  { %v173_v33 = vmul.f32 %v171_v32, %v166_v30 }
 0x179   :  { %v181_v34 = vpop.permute.xlu1 %180 }
 0x17a   :  { %v183_v35 = vadd.f32 %v181_v34, %v173_v33 }
 0x17c   :  { %1324 = vtanh.f32 %v183_v35 }
 0x182   :  { %v1325_v36 = vpop.eup %1324 }
 0x183   :  { %186 = vrot.lane.b32.xlu1 %v1325_v36, %s1447_s12 }
 0x1f5   :  { %v187_v37 = vpop.permute.xlu1 %186 }
 0x1f6   :  { %v1563_v38 = vmul.f32 %v187_v37, %v166_v30 }
 0x1f8   :  { %v195_v39 = vpack.c.bf16 %v1563_v38, %v1563_v38 }
 0x1fa   :  { %197 = vrot.lane.b32.xlu2 %v195_v39, %s1448_s15 }
 0x254   :  { %v198_v40 = vpop.permute.xlu2 %197 }
 0x255   :  { %1253 = vmatmul.msk.bf16.vlgmr.msra.gmra.mxu2 %vm75_vm0, %v198_v40 }
 0x256   :  { %586 = vmatpush.bf16.msra.mxu2 %v1515_v1 }
 0x25a   :  { %587 = vmatpush.bf16.msra.mxu2 %v1523_v3  ;;  %v42_v3 = vld [vmem:[%s1816_s0 + $0x18] sm:$0xff] }
 0x25b   :  { %v56_v4 = vpack.c.bf16 %v42_v3, %v41_v2  ;;  %v44_v2 = vld [vmem:[%s1816_s0 + $0x28] sm:$0xff] }
 0x25d   :  { %1240 = vmatmul.msk.bf16.gmra.mxu0 %vm75_vm0, %v56_v4 }
 0x2d8   :  { %v211_v43 = vpop.f32.mrf.mxu2 }
 0x2d9   :  { %v215_v44 = vadd.f32 %v211_v43, %v100_v42 }
 0x2da   :  { %v102_v10 = vpop.f32.mrf.mxu0 }
 0x2db   :  { %1326 = vtanh.f32 %v215_v44  ;;  %v1254_v47 = vmul.f32 -1.442695, %v215_v44  ;;  %v103_v11 = vadd.f32 %v1553_v9, %v102_v10 }
 0x2dd   :  { %1328 = vpow2.f32 %v1254_v47 }
 0x2e0   :  { %v213_v45 = vpop.f32.mrf.mxu2 }
 0x2e1   :  { %v1327_v46 = vpop.eup %1326 }
 0x2e2   :  { %238 = vrot.lane.b32.xlu2 %v1327_v46, %s1447_s12  ;;  %v104_v40 = vpop.f32.mrf.mxu0 }
 0x2e3   :  { %v1329_v48 = vpop.eup %1328  ;;  %v105_v41 = vadd.f32 %v1553_v9, %v104_v40 }
 0x2e4   :  { %v219_v49 = vadd.f32 1.0, %v1329_v48 }
 0x2e6   :  { %1330 = vrcp.f32 %v219_v49  ;;  %v231_v55 = vand.u32 2147483648, %v219_v49  ;;  %vm225_vm6 = vweird.f32 %v219_v49  ;;  %v229_v56 = vand.u32 2147483647, %v219_v49 }
 0x2e8   :  { %v232_v58 = vor.u32 1.1754944e-38, %v231_v55  ;;  %vm230_vm8 = vcmp.eq.f32.partialorder %v229_v56, 8.507059e+37 }
 0x2ec   :  { %v1331_v50 = vpop.eup %1330 }
 0x2ed   :  { %v221_v51 = vmul.f32 %v1331_v50, %v219_v49  ;;  %vm226_vm5 = vweird.f32 %v1331_v50 }
 0x2ee   :  { %vm227_vm7 = vmor %vm225_vm6, %vm226_vm5 }
 0x2ef   :  { %v222_v52 = vsub.f32 1.0, %v221_v51 }
 0x2f1   :  { %v223_v53 = vmul.f32 %v1331_v50, %v222_v52 }
 0x2f3   :  { %v224_v54 = vadd.f32 %v1331_v50, %v223_v53 }
 0x2f5   :  { %v228_v57 = vsel %vm227_vm7, %v1331_v50, %v224_v54 }
 0x2f6   :  { %v233_v60 = vsel %vm230_vm8, %v232_v58, %v228_v57 }
 0x2f7   :  { %v236_v62 = vmul.f32 %v233_v60, %v183_v35 }
 0x33c   :  { %v239_v59 = vpop.permute.xlu2 %238 }
 0x33d   :  { %v241_v61 = vmul.f32 %v239_v59, %v233_v60 }
 0x33f   :  { %243 = vrot.lane.b32.xlu0 %v241_v61, %s1448_s15 }
 0x3b1   :  { %v244_v63 = vpop.permute.xlu0 %243 }
 0x3b2   :  { %v246_v0 = vadd.f32 %v244_v63, %v236_v62 }
 0x3b4   :  { %1332 = vtanh.f32 %v246_v0 }
 0x3ba   :  { %v1333_v1 = vpop.eup %1332 }
 0x3bb   :  { %249 = vrot.lane.b32.xlu1 %v1333_v1, %s1447_s12  ;;  %v43_v1 = vld [vmem:[%s1816_s0 + $0x20] sm:$0xff] }
 0x3bc   :  { %v57_v3 = vpack.c.bf16 %v44_v2, %v43_v1 }
 0x3be   :  { %1241 = vmatmul.msk.bf16.gmra.mxu0 %vm75_vm0, %v57_v3 }
 0x42d   :  { %v250_v5 = vpop.permute.xlu1 %249 }
 0x42e   :  { %v1582_v6 = vmul.f32 %v250_v5, %v233_v60 }
 0x430   :  { %v258_v7 = vpack.c.bf16 %v1582_v6, %v1582_v6 }
 0x432   :  { %260 = vrot.lane.b32.xlu2 %v258_v7, %s1448_s15 }
 0x43b   :  { %v107_v10 = vpop.f32.mrf.mxu0 }
 0x48c   :  { %v261_v8 = vpop.permute.xlu2 %260 }
 0x48d   :  { %1255 = vmatmul.msk.bf16.vlgmr.msra.gmra.mxu3 %vm75_vm0, %v261_v8 }
 0x510   :  { %v274_v12 = vpop.f32.mrf.mxu3 }
 0x511   :  { %v278_v13 = vadd.f32 %v274_v12, %v103_v11  ;;  %v108_v11 = vadd.f32 %v1553_v9, %v107_v10 }
 0x513   :  { %1334 = vtanh.f32 %v278_v13  ;;  %v1256_v16 = vmul.f32 -1.442695, %v278_v13 }
 0x515   :  { %1336 = vpow2.f32 %v1256_v16 }
 0x518   :  { %v276_v14 = vpop.f32.mrf.mxu3 }
 0x519   :  { %v1335_v15 = vpop.eup %1334 }
 0x51a   :  { %301 = vrot.lane.b32.xlu0 %v1335_v15, %s1447_s12 }
 0x51b   :  { %v1337_v17 = vpop.eup %1336 }
 0x51c   :  { %v282_v18 = vadd.f32 1.0, %v1337_v17 }
 0x51e   :  { %1338 = vrcp.f32 %v282_v18  ;;  %v294_v24 = vand.u32 2147483648, %v282_v18  ;;  %vm288_vm10 = vweird.f32 %v282_v18  ;;  %v292_v25 = vand.u32 2147483647, %v282_v18 }
 0x520   :  { %v295_v27 = vor.u32 1.1754944e-38, %v294_v24  ;;  %vm293_vm12 = vcmp.eq.f32.partialorder %v292_v25, 8.507059e+37 }
 0x524   :  { %v1339_v19 = vpop.eup %1338 }
 0x525   :  { %v284_v20 = vmul.f32 %v1339_v19, %v282_v18  ;;  %vm289_vm9 = vweird.f32 %v1339_v19 }
 0x526   :  { %vm290_vm11 = vmor %vm288_vm10, %vm289_vm9 }
 0x527   :  { %v285_v21 = vsub.f32 1.0, %v284_v20 }
 0x529   :  { %v286_v22 = vmul.f32 %v1339_v19, %v285_v21 }
 0x52b   :  { %v287_v23 = vadd.f32 %v1339_v19, %v286_v22 }
 0x52d   :  { %v291_v26 = vsel %vm290_vm11, %v1339_v19, %v287_v23 }
 0x52e   :  { %v296_v29 = vsel %vm293_vm12, %v295_v27, %v291_v26 }
 0x52f   :  { %v299_v31 = vmul.f32 %v296_v29, %v246_v0 }
 0x58c   :  { %v302_v28 = vpop.permute.xlu0 %301 }
 0x58d   :  { %v304_v30 = vmul.f32 %v302_v28, %v296_v29 }
 0x58f   :  { %306 = vrot.lane.b32.xlu1 %v304_v30, %s1448_s15 }
 0x601   :  { %v307_v32 = vpop.permute.xlu1 %306 }
 0x602   :  { %v309_v33 = vadd.f32 %v307_v32, %v299_v31 }
 0x604   :  { %1340 = vtanh.f32 %v309_v33 }
 0x60a   :  { %v1341_v34 = vpop.eup %1340 }
 0x60b   :  { %312 = vrot.lane.b32.xlu2 %v1341_v34, %s1447_s12 }
 0x665   :  { %v313_v35 = vpop.permute.xlu2 %312 }
 0x666   :  { %v1592_v36 = vmul.f32 %v313_v35, %v296_v29 }
 0x668   :  { %v321_v37 = vpack.c.bf16 %v1592_v36, %v1592_v36 }
 0x66a   :  { %323 = vrot.lane.b32.xlu0 %v321_v37, %s1448_s15 }
 0x6dc   :  { %v324_v39 = vpop.permute.xlu0 %323 }
 0x6dd   :  { %1257 = vmatmul.msk.bf16.vlgmr.msrb.gmra.mxu1 %vm75_vm0, %v324_v39 }
 0x75a   :  { %v337_v42 = vpop.f32.mrf.mxu1 }
 0x75b   :  { %v341_v43 = vadd.f32 %v337_v42, %v105_v41  ;;  %v109_v41 = vpop.f32.mrf.mxu0 }
 0x75c   :  { %v110_v42 = vadd.f32 %v1553_v9, %v109_v41 }
 0x75d   :  { %1342 = vtanh.f32 %v341_v43  ;;  %v1258_v46 = vmul.f32 -1.442695, %v341_v43 }
 0x75f   :  { %1344 = vpow2.f32 %v1258_v46 }
 0x762   :  { %v339_v44 = vpop.f32.mrf.mxu1 }
 0x763   :  { %v1343_v45 = vpop.eup %1342 }
 0x764   :  { %364 = vrot.lane.b32.xlu1 %v1343_v45, %s1447_s12 }
 0x765   :  { %v1345_v47 = vpop.eup %1344 }
 0x766   :  { %v345_v48 = vadd.f32 1.0, %v1345_v47 }
 0x768   :  { %1346 = vrcp.f32 %v345_v48  ;;  %v357_v54 = vand.u32 2147483648, %v345_v48  ;;  %vm351_vm14 = vweird.f32 %v345_v48  ;;  %v355_v55 = vand.u32 2147483647, %v345_v48 }
 0x76a   :  { %v358_v57 = vor.u32 1.1754944e-38, %v357_v54  ;;  %vm356_vm1 = vcmp.eq.f32.partialorder %v355_v55, 8.507059e+37 }
 0x76e   :  { %v1347_v49 = vpop.eup %1346 }
 0x76f   :  { %v347_v50 = vmul.f32 %v1347_v49, %v345_v48  ;;  %vm352_vm13 = vweird.f32 %v1347_v49 }
 0x770   :  { %vm353_vm15 = vmor %vm351_vm14, %vm352_vm13 }
 0x771   :  { %v348_v51 = vsub.f32 1.0, %v347_v50 }
 0x773   :  { %v349_v52 = vmul.f32 %v1347_v49, %v348_v51 }
 0x775   :  { %v350_v53 = vadd.f32 %v1347_v49, %v349_v52 }
 0x777   :  { %v354_v56 = vsel %vm353_vm15, %v1347_v49, %v350_v53 }
 0x778   :  { %v359_v59 = vsel %vm356_vm1, %v358_v57, %v354_v56 }
 0x779   :  { %v362_v61 = vmul.f32 %v359_v59, %v309_v33 }
 0x7d6   :  { %v365_v58 = vpop.permute.xlu1 %364 }
 0x7d7   :  { %v367_v60 = vmul.f32 %v365_v58, %v359_v59 }
 0x7d9   :  { %369 = vrot.lane.b32.xlu2 %v367_v60, %s1448_s15 }
 0x833   :  { %v370_v62 = vpop.permute.xlu2 %369 }
 0x834   :  { %v372_v63 = vadd.f32 %v370_v62, %v362_v61  ;;  %v1311_v62 = vld [vmem:[%s1820_s4 + $0x8] sm:$0xff] }
 0x835   :  { %690 = vmatpush.bf16.msra.mxu3 %v1311_v62 }
 0x836   :  { %1348 = vtanh.f32 %v372_v63 }
 0x83c   :  { %v1349_v0 = vpop.eup %1348 }
 0x83d   :  { %375 = vrot.lane.b32.xlu0 %v1349_v0, %s1447_s12 }
 0x8af   :  { %v376_v4 = vpop.permute.xlu0 %375 }
 0x8b0   :  { %v1609_v5 = vmul.f32 %v376_v4, %v359_v59 }
 0x8b2   :  { %v384_v7 = vpack.c.bf16 %v1609_v5, %v1609_v5 }
 0x8b4   :  { %386 = vrot.lane.b32.xlu1 %v384_v7, %s1448_s15 }
 0x926   :  { %v387_v8 = vpop.permute.xlu1 %386 }
 0x927   :  { %1259 = vmatmul.msk.bf16.vlgmr.msrb.gmra.mxu2 %vm75_vm0, %v387_v8 }
 0x9aa   :  { %v400_v12 = vpop.f32.mrf.mxu2 }
 0x9ab   :  { %v404_v13 = vadd.f32 %v400_v12, %v108_v11 }
 0x9ad   :  { %1350 = vtanh.f32 %v404_v13  ;;  %v1260_v16 = vmul.f32 -1.442695, %v404_v13  ;;  %v45_v13 = vld [vmem:[%s1816_s0 + $0x30] sm:$0xff] }
 0x9af   :  { %1352 = vpow2.f32 %v1260_v16  ;;  %v1660_v16 = vld [vmem:[%s1822_s5 + $0x8] sm:$0xff] }
 0x9b0   :  { %739 = vmatpush.bf16.msrb.mxu1 %v1660_v16  ;;  %801 = vmatpush.bf16.msrb.mxu2 %v1660_v16 }
 0x9b1   :  { %859 = vmatpush.bf16.msrb.mxu0 %v1660_v16 }
 0x9b2   :  { %v402_v14 = vpop.f32.mrf.mxu2 }
 0x9b3   :  { %v1351_v15 = vpop.eup %1350  ;;  %v46_v14 = vld [vmem:[%s1816_s0 + $0x38] sm:$0xff] }
 0x9b4   :  { %427 = vrot.lane.b32.xlu2 %v1351_v15, %s1447_s12  ;;  %v58_v15 = vpack.c.bf16 %v46_v14, %v45_v13 }
 0x9b5   :  { %v1353_v17 = vpop.eup %1352 }
 0x9b6   :  { %v408_v18 = vadd.f32 1.0, %v1353_v17  ;;  %1242 = vmatmul.msk.bf16.gmra.mxu0 %vm75_vm0, %v58_v15  ;;  %v1666_v17 = vld [vmem:[%s1822_s5] sm:$0xff] }
 0x9b7   :  { %740 = vmatpush.bf16.msrb.mxu1 %v1666_v17  ;;  %802 = vmatpush.bf16.msrb.mxu2 %v1666_v17 }
 0x9b8   :  { %1354 = vrcp.f32 %v408_v18  ;;  %v420_v24 = vand.u32 2147483648, %v408_v18  ;;  %vm414_vm3 = vweird.f32 %v408_v18  ;;  %v418_v25 = vand.u32 2147483647, %v408_v18  ;;  %860 = vmatpush.bf16.msrb.mxu0 %v1666_v17 }
 0x9ba   :  { %v421_v27 = vor.u32 1.1754944e-38, %v420_v24  ;;  %vm419_vm5 = vcmp.eq.f32.partialorder %v418_v25, 8.507059e+37 }
 0x9bc   :  { %1033 = vmatpush.bf16.msra.mxu0 %v1660_v16 }
 0x9be   :  { %v1355_v19 = vpop.eup %1354 }
 0x9bf   :  { %v410_v20 = vmul.f32 %v1355_v19, %v408_v18  ;;  %vm415_vm2 = vweird.f32 %v1355_v19 }
 0x9c0   :  { %vm416_vm4 = vmor %vm414_vm3, %vm415_vm2  ;;  %1034 = vmatpush.bf16.msra.mxu0 %v1666_v17 }
 0x9c1   :  { %v411_v21 = vsub.f32 1.0, %v410_v20 }
 0x9c3   :  { %v412_v22 = vmul.f32 %v1355_v19, %v411_v21 }
 0x9c5   :  { %v413_v23 = vadd.f32 %v1355_v19, %v412_v22 }
 0x9c7   :  { %v417_v26 = vsel %vm416_vm4, %v1355_v19, %v413_v23  ;;  %v1279_v19 = vld [vmem:[%s1817_s7 + $0x8] sm:$0xff] }
 0x9c8   :  { %v422_v29 = vsel %vm419_vm5, %v421_v27, %v417_v26  ;;  %v717_v20 = vpack.c.bf16 %v1279_v19, %v1279_v19  ;;  %v1689_v27 = vld [vmem:[%s1821_s6] ss:$0 sm:$0xff] }
 0x9c9   :  { %v425_v31 = vmul.f32 %v422_v29, %v372_v63  ;;  %v1310_v63 = vld [vmem:[%s1820_s4] sm:$0xff] }
 0x9ca   :  { %691 = vmatpush.bf16.msra.mxu3 %v1310_v63 }
 0xa0e   :  { %v428_v28 = vpop.permute.xlu2 %427 }
 0xa0f   :  { %v430_v30 = vmul.f32 %v428_v28, %v422_v29 }
 0xa11   :  { %432 = vrot.lane.b32.xlu0 %v430_v30, %s1448_s15  ;;  %v1280_v30 = vld [vmem:[%s1819_s8 + $0x8] sm:$0xff] }
 0xa33   :  { %v112_v21 = vpop.f32.mrf.mxu0 }
 0xa34   :  { %v113_v22 = vadd.f32 %v1553_v9, %v112_v21 }
 0xa83   :  { %v433_v32 = vpop.permute.xlu0 %432 }
 0xa84   :  { %v435_v33 = vadd.f32 %v433_v32, %v425_v31 }
 0xa86   :  { %1356 = vtanh.f32 %v435_v33 }
 0xa8c   :  { %v1357_v34 = vpop.eup %1356 }
 0xa8d   :  { %438 = vrot.lane.b32.xlu1 %v1357_v34, %s1447_s12 }
 0xaff   :  { %v439_v35 = vpop.permute.xlu1 %438 }
 0xb00   :  { %v1619_v37 = vmul.f32 %v439_v35, %v422_v29 }
 0xb02   :  { %v447_v39 = vpack.c.bf16 %v1619_v37, %v1619_v37 }
 0xb04   :  { %449 = vrot.lane.b32.xlu2 %v447_v39, %s1448_s15 }
 0xb5e   :  { %v450_v40 = vpop.permute.xlu2 %449 }
 0xb5f   :  { %1261 = vmatmul.msk.bf16.vlgmr.msrb.gmra.mxu3 %vm75_vm0, %v450_v40 }
 0xbe2   :  { %v463_v43 = vpop.f32.mrf.mxu3 }
 0xbe3   :  { %v467_v44 = vadd.f32 %v463_v43, %v110_v42 }
 0xbe5   :  { %1358 = vtanh.f32 %v467_v44  ;;  %v1262_v47 = vmul.f32 -1.442695, %v467_v44 }
 0xbe7   :  { %1360 = vpow2.f32 %v1262_v47 }
 0xbea   :  { %v465_v45 = vpop.f32.mrf.mxu3 }
 0xbeb   :  { %v1359_v46 = vpop.eup %1358 }
 0xbec   :  { %490 = vrot.lane.b32.xlu0 %v1359_v46, %s1447_s12 }
 0xbed   :  { %v1361_v48 = vpop.eup %1360 }
 0xbee   :  { %v471_v49 = vadd.f32 1.0, %v1361_v48 }
 0xbf0   :  { %1362 = vrcp.f32 %v471_v49  ;;  %v483_v55 = vand.u32 2147483648, %v471_v49  ;;  %vm477_vm7 = vweird.f32 %v471_v49  ;;  %v481_v56 = vand.u32 2147483647, %v471_v49 }
 0xbf2   :  { %v484_v58 = vor.u32 1.1754944e-38, %v483_v55  ;;  %vm482_vm9 = vcmp.eq.f32.partialorder %v481_v56, 8.507059e+37 }
 0xbf4   :  { %191 = vrot.lane.b32.xlu0 %v1563_v38, %s1448_s15 }
 0xbf6   :  { %v1363_v50 = vpop.eup %1362 }
 0xbf7   :  { %v473_v51 = vmul.f32 %v1363_v50, %v471_v49  ;;  %vm478_vm6 = vweird.f32 %v1363_v50 }
 0xbf8   :  { %vm479_vm8 = vmor %vm477_vm7, %vm478_vm6 }
 0xbf9   :  { %v474_v52 = vsub.f32 1.0, %v473_v51 }
 0xbfb   :  { %v475_v53 = vmul.f32 %v1363_v50, %v474_v52 }
 0xbfd   :  { %v476_v54 = vadd.f32 %v1363_v50, %v475_v53 }
 0xbff   :  { %v480_v57 = vsel %vm479_vm8, %v1363_v50, %v476_v54 }
 0xc00   :  { %v485_v38 = vsel %vm482_vm9, %v484_v58, %v480_v57 }
 0xc01   :  { %v488_v0 = vmul.f32 %v485_v38, %v435_v33 }
 0xc5e   :  { %v491_v59 = vpop.permute.xlu0 %490 }
 0xc5f   :  { %v493_v60 = vmul.f32 %v491_v59, %v485_v38 }
 0xc61   :  { %495 = vrot.lane.b32.xlu1 %v493_v60, %s1448_s15 }
 0xc66   :  { %v192_v61 = vpop.permute.xlu0 %191 }
 0xc67   :  { %194 = vst.msk [vmem:[#allocation2] sm:$0xff] %vm75_vm0, %v192_v61 }
 0xc69   :  { %254 = vrot.lane.b32.xlu1 %v1582_v6, %s1448_s15 }
 0xc6e   :  { %v636_v6 = vld [vmem:[#allocation2] sm:$0xff] }
 0xcd3   :  { %v496_v1 = vpop.permute.xlu1 %495 }
 0xcd4   :  { %v1639_v2 = vadd.f32 %v496_v1, %v488_v0 }
 0xcd6   :  { %1364 = vtanh.f32 %v1639_v2 }
 0xcdb   :  { %v255_v3 = vpop.permute.xlu1 %254 }
 0xcdc   :  { %v1365_v4 = vpop.eup %1364  ;;  %257 = vst.msk [vmem:[#allocation2 + $0x8] sm:$0xff] %vm75_vm0, %v255_v3 }
 0xcdd   :  { %501 = vrot.lane.b32.xlu2 %v1365_v4, %s1447_s12 }
 0xce3   :  { %v637_v7 = vld [vmem:[#allocation2 + $0x8] sm:$0xff] }
 0xce4   :  { %v652_v8 = vpack.c.bf16 %v637_v7, %v636_v6 }
 0xce6   :  { %1275 = vmatmul.msk.bf16.vlgmr.msra.gmra.mxu3 %vm75_vm0, %v652_v8 }
 0xd37   :  { %v502_v10 = vpop.permute.xlu2 %501 }
 0xd38   :  { %v1645_v11 = vmul.f32 %v502_v10, %v485_v38 }
 0xd3a   :  { %v510_v12 = vpack.c.bf16 %v1645_v11, %v1645_v11 }
 0xd3c   :  { %512 = vrot.lane.b32.xlu2 %v510_v12, %s1448_s15 }
 0xd69   :  { %v693_v28 = vpop.f32.mrf.mxu3 }
 0xd6a   :  { %v694_v29 = vadd.f32 %v1689_v27, %v693_v28 }
 0xd96   :  { %v513_v18 = vpop.permute.xlu2 %512 }
 0xd97   :  { %1263 = vmatmul.msk.bf16.vlgmr.msra.gmra.mxu1 %vm75_vm0, %v513_v18 }
 0xd98   :  { %917 = vmatpush.bf16.msra.mxu1 %v1660_v16 }
 0xd9c   :  { %918 = vmatpush.bf16.msra.mxu1 %v1666_v17 }
 0xda7   :  { %1289 = vmatmul.msk.bf16.vlgmr.msrb.gmra.mxu1 %vm75_vm0, %v717_v20 }
 0xda8   :  { %1091 = vmatpush.bf16.msrb.mxu1 %v1660_v16 }
 0xdac   :  { %1092 = vmatpush.bf16.msrb.mxu1 %v1666_v17 }
 0xe14   :  { %v526_v23 = vpop.f32.mrf.mxu1 }
 0xe15   :  { %v530_v24 = vadd.f32 %v526_v23, %v113_v22 }
 0xe17   :  { %1366 = vtanh.f32 %v530_v24  ;;  %v1264_v34 = vmul.f32 -1.442695, %v530_v24 }
 0xe1c   :  { %v528_v25 = vpop.f32.mrf.mxu1 }
 0xe1d   :  { %v1367_v26 = vpop.eup %1366 }
 0xe1e   :  { %553 = vrot.lane.b32.xlu0 %v1367_v26, %s1447_s12  ;;  %v695_v26 = vpop.f32.mrf.mxu3 }
 0xe1f   :  { %v696_v28 = vadd.f32 %v1689_v27, %v695_v26 }
 0xe24   :  { %v742_v9 = vpop.f32.mrf.mxu1 }
 0xe25   :  { %v746_v31 = vadd.f32 %v742_v9, %v694_v29 }
 0xe26   :  { %768 = vrot.lane.b32.xlu0 %v1280_v30, %s1448_s15 }
 0xe27   :  { %1368 = vtanh.f32 %v746_v31  ;;  %v1290_v40 = vmul.f32 -1.442695, %v746_v31 }
 0xe28   :  { %1370 = vpow2.f32 %v1264_v34 }
 0xe2c   :  { %v744_v32 = vpop.f32.mrf.mxu1 }
 0xe2d   :  { %v1369_v33 = vpop.eup %1368 }
 0xe2e   :  { %773 = vrot.lane.b32.xlu1 %v1369_v33, %s1447_s12  ;;  %v1371_v35 = vpop.eup %1370 }
 0xe2f   :  { %v534_v39 = vadd.f32 1.0, %v1371_v35 }
 0xe31   :  { %1372 = vrcp.f32 %v534_v39  ;;  %v546_v49 = vand.u32 2147483648, %v534_v39  ;;  %vm540_vm11 = vweird.f32 %v534_v39  ;;  %v544_v50 = vand.u32 2147483647, %v534_v39 }
 0xe32   :  { %1374 = vpow2.f32 %v1290_v40 }
 0xe33   :  { %v547_v53 = vor.u32 1.1754944e-38, %v546_v49  ;;  %vm545_vm13 = vcmp.eq.f32.partialorder %v544_v50, 8.507059e+37 }
 0xe37   :  { %v1373_v41 = vpop.eup %1372 }
 0xe38   :  { %v1375_v42 = vpop.eup %1374  ;;  %v536_v43 = vmul.f32 %v1373_v41, %v534_v39  ;;  %vm541_vm10 = vweird.f32 %v1373_v41 }
 0xe39   :  { %v750_v44 = vadd.f32 1.0, %v1375_v42  ;;  %vm542_vm12 = vmor %vm540_vm11, %vm541_vm10 }
 0xe3a   :  { %v537_v45 = vsub.f32 1.0, %v536_v43 }
 0xe3b   :  { %1376 = vrcp.f32 %v750_v44  ;;  %v762_v38 = vand.u32 2147483648, %v750_v44  ;;  %vm756_vm15 = vweird.f32 %v750_v44  ;;  %v760_v60 = vand.u32 2147483647, %v750_v44 }
 0xe3c   :  { %v538_v46 = vmul.f32 %v1373_v41, %v537_v45 }
 0xe3d   :  { %v763_v62 = vor.u32 1.1754944e-38, %v762_v38  ;;  %vm761_vm2 = vcmp.eq.f32.partialorder %v760_v60, 8.507059e+37 }
 0xe3e   :  { %v539_v47 = vadd.f32 %v1373_v41, %v538_v46 }
 0xe40   :  { %v543_v51 = vsel %vm542_vm12, %v1373_v41, %v539_v47 }
 0xe41   :  { %v1377_v48 = vpop.eup %1376  ;;  %v548_v55 = vsel %vm545_vm13, %v547_v53, %v543_v51 }
 0xe42   :  { %v752_v52 = vmul.f32 %v1377_v48, %v750_v44  ;;  %vm757_vm14 = vweird.f32 %v1377_v48  ;;  %v551_v3 = vmul.f32 %v548_v55, %v1639_v2 }
 0xe43   :  { %vm758_vm1 = vmor %vm756_vm15, %vm757_vm14 }
 0xe44   :  { %v753_v57 = vsub.f32 1.0, %v752_v52 }
 0xe46   :  { %v754_v58 = vmul.f32 %v1377_v48, %v753_v57 }
 0xe48   :  { %v755_v59 = vadd.f32 %v1377_v48, %v754_v58 }
 0xe4a   :  { %v759_v61 = vsel %vm758_vm1, %v1377_v48, %v755_v59  ;;  %v1732_v59 = vpop.f32.mrf.mxu0 }
 0xe4b   :  { %v764_v63 = vsel %vm761_vm2, %v763_v62, %v759_v61 }
 0xe90   :  { %v554_v54 = vpop.permute.xlu0 %553 }
 0xe91   :  { %v556_v56 = vmul.f32 %v554_v54, %v548_v55 }
 0xe93   :  { %558 = vrot.lane.b32.xlu2 %v556_v56, %s1448_s15 }
 0xe98   :  { %v769_v8 = vpop.permute.xlu0 %768 }
 0xe99   :  { %v771_v10 = vmul.f32 %v769_v8, %v764_v63 }
 0xea0   :  { %v774_v0 = vpop.permute.xlu1 %773 }
 0xea1   :  { %v776_v1 = vmul.f32 %v774_v0, %v764_v63 }
 0xea3   :  { %778 = vrot.lane.b32.xlu1 %v776_v1, %s1448_s15 }
 0xeed   :  { %v559_v4 = vpop.permute.xlu2 %558 }
 0xeee   :  { %v1700_v6 = vadd.f32 %v559_v4, %v551_v3 }
 0xef0   :  { %1378 = vtanh.f32 %v1700_v6 }
 0xef6   :  { %v1379_v7 = vpop.eup %1378 }
 0xef7   :  { %564 = vrot.lane.b32.xlu2 %v1379_v7, %s1447_s12 }
 0xf15   :  { %v779_v12 = vpop.permute.xlu1 %778 }
 0xf16   :  { %v781_v13 = vadd.f32 %v779_v12, %v771_v10 }
 0xf18   :  { %1380 = vtanh.f32 %v781_v13 }
 0xf1e   :  { %v1381_v14 = vpop.eup %1380 }
 0xf1f   :  { %784 = vrot.lane.b32.xlu0 %v1381_v14, %s1447_s12 }
 0xf51   :  { %v565_v15 = vpop.permute.xlu2 %564 }
 0xf52   :  { %v1705_v18 = vmul.f32 %v565_v15, %v548_v55 }
 0xf54   :  { %v573_v2 = vpack.c.bf16 %v1705_v18, %v1705_v18 }
 0xf56   :  { %575 = vrot.lane.b32.xlu1 %v573_v2, %s1448_s15 }
 0xf91   :  { %v785_v19 = vpop.permute.xlu0 %784 }
 0xf92   :  { %v787_v20 = vmul.f32 %v785_v19, %v764_v63 }
 0xf94   :  { %v788_v21 = vpack.c.bf16 %v787_v20, %v787_v20 }
 0xf96   :  { %790 = vrot.lane.b32.xlu2 %v788_v21, %s1448_s15 }
 0xfc8   :  { %v576_v22 = vpop.permute.xlu1 %575 }
 0xfc9   :  { %1265 = vmatmul.msk.bf16.vlgmr.msra.gmra.mxu2 %vm75_vm0, %v576_v22 }
 0xfca   :  { %975 = vmatpush.bf16.msra.mxu2 %v1660_v16 }
 0xfce   :  { %976 = vmatpush.bf16.msra.mxu2 %v1666_v17 }
 0xff0   :  { %v791_v23 = vpop.permute.xlu2 %790 }
 0xff1   :  { %1291 = vmatmul.msk.bf16.vlgmr.msrb.gmra.mxu2 %vm75_vm0, %v791_v23 }
 0xff2   :  { %1149 = vmatpush.bf16.msrb.mxu2 %v1660_v16 }
 0xff6   :  { %1150 = vmatpush.bf16.msrb.mxu2 %v1666_v17 }
0x104c   :  { %v1717_v24 = vpop.f32.mrf.mxu2 }
0x1054   :  { %v591_v25 = vpop.f32.mrf.mxu2 }
0x1074   :  { %v804_v29 = vpop.f32.mrf.mxu2 }
0x1075   :  { %v808_v30 = vadd.f32 %v804_v29, %v696_v28 }
0x1077   :  { %1382 = vtanh.f32 %v808_v30  ;;  %v1292_v32 = vmul.f32 -1.442695, %v808_v30 }
0x1079   :  { %1384 = vpow2.f32 %v1292_v32 }
0x107c   :  { %v806_v9 = vpop.f32.mrf.mxu2 }
0x107d   :  { %v1383_v31 = vpop.eup %1382 }
0x107e   :  { %831 = vrot.lane.b32.xlu0 %v1383_v31, %s1447_s12 }
0x107f   :  { %v1385_v16 = vpop.eup %1384 }
0x1080   :  { %v812_v17 = vadd.f32 1.0, %v1385_v16 }
0x1082   :  { %1386 = vrcp.f32 %v812_v17  ;;  %v824_v41 = vand.u32 2147483648, %v812_v17  ;;  %vm818_vm4 = vweird.f32 %v812_v17  ;;  %v822_v42 = vand.u32 2147483647, %v812_v17 }
0x1084   :  { %v825_v44 = vor.u32 1.1754944e-38, %v824_v41  ;;  %vm823_vm6 = vcmp.eq.f32.partialorder %v822_v42, 8.507059e+37 }
0x1086   :  { %317 = vrot.lane.b32.xlu0 %v1592_v36, %s1448_s15 }
0x1088   :  { %v1387_v33 = vpop.eup %1386 }
0x1089   :  { %v814_v34 = vmul.f32 %v1387_v33, %v812_v17  ;;  %vm819_vm3 = vweird.f32 %v1387_v33 }
0x108a   :  { %vm820_vm5 = vmor %vm818_vm4, %vm819_vm3 }
0x108b   :  { %v815_v35 = vsub.f32 1.0, %v814_v34 }
0x108d   :  { %v816_v39 = vmul.f32 %v1387_v33, %v815_v35 }
0x108f   :  { %v817_v40 = vadd.f32 %v1387_v33, %v816_v39 }
0x1091   :  { %v821_v43 = vsel %vm820_vm5, %v1387_v33, %v817_v40 }
0x1092   :  { %v826_v36 = vsel %vm823_vm6, %v825_v44, %v821_v43 }
0x1093   :  { %v829_v48 = vmul.f32 %v826_v36, %v781_v13 }
0x10f0   :  { %v832_v45 = vpop.permute.xlu0 %831 }
0x10f1   :  { %v834_v46 = vmul.f32 %v832_v45, %v826_v36 }
0x10f3   :  { %836 = vrot.lane.b32.xlu1 %v834_v46, %s1448_s15 }
0x10f8   :  { %v318_v47 = vpop.permute.xlu0 %317 }
0x10f9   :  { %320 = vst.msk [vmem:[#allocation2 + $0x10] sm:$0xff] %vm75_vm0, %v318_v47 }
0x10fb   :  { %380 = vrot.lane.b32.xlu1 %v1609_v5, %s1448_s15 }
0x1100   :  { %v638_v53 = vld [vmem:[#allocation2 + $0x10] sm:$0xff] }
0x1165   :  { %v837_v49 = vpop.permute.xlu1 %836 }
0x1166   :  { %v839_v50 = vadd.f32 %v837_v49, %v829_v48 }
0x1168   :  { %1388 = vtanh.f32 %v839_v50 }
0x116d   :  { %v381_v51 = vpop.permute.xlu1 %380 }
0x116e   :  { %v1389_v52 = vpop.eup %1388  ;;  %383 = vst.msk [vmem:[#allocation2 + $0x18] sm:$0xff] %vm75_vm0, %v381_v51 }
0x116f   :  { %842 = vrot.lane.b32.xlu2 %v1389_v52, %s1447_s12 }
0x1175   :  { %v639_v54 = vld [vmem:[#allocation2 + $0x18] sm:$0xff] }
0x1176   :  { %v653_v55 = vpack.c.bf16 %v639_v54, %v638_v53 }
0x1178   :  { %1276 = vmatmul.msk.bf16.gmra.mxu3 %vm75_vm0, %v653_v55 }
0x11c9   :  { %v843_v56 = vpop.permute.xlu2 %842 }
0x11ca   :  { %v845_v57 = vmul.f32 %v843_v56, %v826_v36 }
0x11cc   :  { %v846_v58 = vpack.c.bf16 %v845_v57, %v845_v57 }
0x11ce   :  { %848 = vrot.lane.b32.xlu2 %v846_v58, %s1448_s15 }
0x11fb   :  { %v698_v38 = vpop.f32.mrf.mxu3 }
0x11fc   :  { %v699_v60 = vadd.f32 %v1689_v27, %v698_v38 }
0x1203   :  { %v700_v32 = vpop.f32.mrf.mxu3 }
0x1204   :  { %v701_v16 = vadd.f32 %v1689_v27, %v700_v32 }
0x1228   :  { %v849_v5 = vpop.permute.xlu2 %848 }
0x1229   :  { %1293 = vmatmul.msk.bf16.vlgmr.msrb.gmra.mxu0 %vm75_vm0, %v849_v5 }
0x12a6   :  { %v862_v61 = vpop.f32.mrf.mxu0 }
0x12a7   :  { %v866_v62 = vadd.f32 %v862_v61, %v699_v60 }
0x12a9   :  { %1390 = vtanh.f32 %v866_v62  ;;  %v1294_v1 = vmul.f32 -1.442695, %v866_v62 }
0x12ab   :  { %1392 = vpow2.f32 %v1294_v1 }
0x12ae   :  { %v864_v63 = vpop.f32.mrf.mxu0 }
0x12af   :  { %v1391_v0 = vpop.eup %1390 }
0x12b0   :  { %889 = vrot.lane.b32.xlu0 %v1391_v0, %s1447_s12 }
0x12b1   :  { %v1393_v3 = vpop.eup %1392 }
0x12b2   :  { %v870_v4 = vadd.f32 1.0, %v1393_v3 }
0x12b4   :  { %1394 = vrcp.f32 %v870_v4  ;;  %v882_v14 = vand.u32 2147483648, %v870_v4  ;;  %vm876_vm8 = vweird.f32 %v870_v4  ;;  %v880_v15 = vand.u32 2147483647, %v870_v4 }
0x12b6   :  { %v883_v19 = vor.u32 1.1754944e-38, %v882_v14  ;;  %vm881_vm10 = vcmp.eq.f32.partialorder %v880_v15, 8.507059e+37 }
0x12ba   :  { %v1395_v7 = vpop.eup %1394 }
0x12bb   :  { %v872_v8 = vmul.f32 %v1395_v7, %v870_v4  ;;  %vm877_vm7 = vweird.f32 %v1395_v7 }
0x12bc   :  { %vm878_vm9 = vmor %vm876_vm8, %vm877_vm7 }
0x12bd   :  { %v873_v10 = vsub.f32 1.0, %v872_v8 }
0x12bf   :  { %v874_v12 = vmul.f32 %v1395_v7, %v873_v10 }
0x12c1   :  { %v875_v13 = vadd.f32 %v1395_v7, %v874_v12 }
0x12c3   :  { %v879_v2 = vsel %vm878_vm9, %v1395_v7, %v875_v13 }
0x12c4   :  { %v884_v21 = vsel %vm881_vm10, %v883_v19, %v879_v2 }
0x12c5   :  { %v887_v23 = vmul.f32 %v884_v21, %v839_v50 }
0x1322   :  { %v890_v20 = vpop.permute.xlu0 %889 }
0x1323   :  { %v892_v22 = vmul.f32 %v890_v20, %v884_v21 }
0x1325   :  { %894 = vrot.lane.b32.xlu1 %v892_v22, %s1448_s15 }
0x1397   :  { %v895_v25 = vpop.permute.xlu1 %894 }
0x1398   :  { %v897_v26 = vadd.f32 %v895_v25, %v887_v23  ;;  %v1446_v23 = vld [vmem:[%s1818_s3] ss:$0 sm:$0xff] }
0x1399   :  { %v115_v25 = vadd.f32 %v1446_v23, %v1732_v59 }
0x139a   :  { %1396 = vtanh.f32 %v897_v26 }
0x13a0   :  { %v1397_v28 = vpop.eup %1396 }
0x13a1   :  { %900 = vrot.lane.b32.xlu2 %v1397_v28, %s1447_s12  ;;  %v593_v28 = vadd.f32 %v1717_v24, %v115_v25 }
0x13fb   :  { %v901_v29 = vpop.permute.xlu2 %900 }
0x13fc   :  { %v903_v30 = vmul.f32 %v901_v29, %v884_v21 }
0x13fe   :  { %v904_v9 = vpack.c.bf16 %v903_v30, %v903_v30 }
0x1400   :  { %906 = vrot.lane.b32.xlu0 %v904_v9, %s1448_s15 }
0x1472   :  { %v907_v31 = vpop.permute.xlu0 %906 }
0x1473   :  { %1295 = vmatmul.msk.bf16.vlgmr.msra.gmra.mxu1 %vm75_vm0, %v907_v31 }
0x14f0   :  { %v920_v17 = vpop.f32.mrf.mxu1 }
0x14f1   :  { %v924_v33 = vadd.f32 %v920_v17, %v701_v16 }
0x14f3   :  { %1398 = vtanh.f32 %v924_v33  ;;  %v1296_v39 = vmul.f32 -1.442695, %v924_v33  ;;  %v1266_v33 = vmul.f32 -1.442695, %v593_v28 }
0x14f5   :  { %1400 = vpow2.f32 %v1296_v39 }
0x14f8   :  { %v922_v34 = vpop.f32.mrf.mxu1 }
0x14f9   :  { %v1399_v35 = vpop.eup %1398 }
0x14fa   :  { %947 = vrot.lane.b32.xlu1 %v1399_v35, %s1447_s12 }
0x14fb   :  { %v1401_v40 = vpop.eup %1400 }
0x14fc   :  { %v928_v41 = vadd.f32 1.0, %v1401_v40 }
0x14fe   :  { %1402 = vrcp.f32 %v928_v41  ;;  %v940_v46 = vand.u32 2147483648, %v928_v41  ;;  %vm934_vm12 = vweird.f32 %v928_v41  ;;  %v938_v47 = vand.u32 2147483647, %v928_v41 }
0x1500   :  { %v941_v49 = vor.u32 1.1754944e-38, %v940_v46  ;;  %vm939_vm14 = vcmp.eq.f32.partialorder %v938_v47, 8.507059e+37 }
0x1502   :  { %443 = vrot.lane.b32.xlu1 %v1619_v37, %s1448_s15 }
0x1504   :  { %v1403_v42 = vpop.eup %1402 }
0x1505   :  { %v930_v43 = vmul.f32 %v1403_v42, %v928_v41  ;;  %vm935_vm11 = vweird.f32 %v1403_v42 }
0x1506   :  { %vm936_vm13 = vmor %vm934_vm12, %vm935_vm11 }
0x1507   :  { %v931_v44 = vsub.f32 1.0, %v930_v43 }
0x1509   :  { %v932_v45 = vmul.f32 %v1403_v42, %v931_v44 }
0x150b   :  { %v933_v36 = vadd.f32 %v1403_v42, %v932_v45 }
0x150d   :  { %v937_v48 = vsel %vm936_vm13, %v1403_v42, %v933_v36 }
0x150e   :  { %v942_v37 = vsel %vm939_vm14, %v941_v49, %v937_v48 }
0x150f   :  { %v945_v53 = vmul.f32 %v942_v37, %v897_v26 }
0x156c   :  { %v948_v50 = vpop.permute.xlu1 %947 }
0x156d   :  { %v950_v51 = vmul.f32 %v948_v50, %v942_v37 }
0x156f   :  { %952 = vrot.lane.b32.xlu2 %v950_v51, %s1448_s15 }
0x1574   :  { %v444_v52 = vpop.permute.xlu1 %443 }
0x1575   :  { %446 = vst.msk [vmem:[#allocation2 + $0x20] sm:$0xff] %vm75_vm0, %v444_v52 }
0x1577   :  { %506 = vrot.lane.b32.xlu2 %v1645_v11, %s1448_s15 }
0x157c   :  { %v640_v58 = vld [vmem:[#allocation2 + $0x20] sm:$0xff] }
0x15c9   :  { %v953_v54 = vpop.permute.xlu2 %952 }
0x15ca   :  { %v955_v55 = vadd.f32 %v953_v54, %v945_v53 }
0x15cc   :  { %1404 = vtanh.f32 %v955_v55 }
0x15d1   :  { %v507_v56 = vpop.permute.xlu2 %506 }
0x15d2   :  { %v1405_v57 = vpop.eup %1404  ;;  %509 = vst.msk [vmem:[#allocation2 + $0x28] sm:$0xff] %vm75_vm0, %v507_v56 }
0x15d3   :  { %958 = vrot.lane.b32.xlu0 %v1405_v57, %s1447_s12 }
0x15d9   :  { %v641_v5 = vld [vmem:[#allocation2 + $0x28] sm:$0xff] }
0x15da   :  { %v654_v38 = vpack.c.bf16 %v641_v5, %v640_v58 }
0x15dc   :  { %1277 = vmatmul.msk.bf16.gmra.mxu3 %vm75_vm0, %v654_v38 }
0x1645   :  { %v959_v60 = vpop.permute.xlu0 %958 }
0x1646   :  { %v961_v61 = vmul.f32 %v959_v60, %v942_v37 }
0x1648   :  { %v962_v62 = vpack.c.bf16 %v961_v61, %v961_v61 }
0x164a   :  { %964 = vrot.lane.b32.xlu0 %v962_v62, %s1448_s15 }
0x165f   :  { %v703_v63 = vpop.f32.mrf.mxu3 }
0x1660   :  { %v704_v0 = vadd.f32 %v1689_v27, %v703_v63 }
0x1667   :  { %v705_v52 = vpop.f32.mrf.mxu3 }
0x1668   :  { %v706_v53 = vadd.f32 %v1689_v27, %v705_v52 }
0x16bc   :  { %v965_v11 = vpop.permute.xlu0 %964 }
0x16bd   :  { %1297 = vmatmul.msk.bf16.vlgmr.msra.gmra.mxu2 %vm75_vm0, %v965_v11 }
0x1740   :  { %v978_v1 = vpop.f32.mrf.mxu2 }
0x1741   :  { %v982_v3 = vadd.f32 %v978_v1, %v704_v0 }
0x1743   :  { %1406 = vtanh.f32 %v982_v3  ;;  %v1298_v8 = vmul.f32 -1.442695, %v982_v3 }
0x1745   :  { %1408 = vpow2.f32 %v1298_v8 }
0x1748   :  { %v980_v4 = vpop.f32.mrf.mxu2 }
0x1749   :  { %v1407_v7 = vpop.eup %1406 }
0x174a   :  { %1005 = vrot.lane.b32.xlu1 %v1407_v7, %s1447_s12 }
0x174b   :  { %v1409_v10 = vpop.eup %1408 }
0x174c   :  { %v986_v12 = vadd.f32 1.0, %v1409_v10 }
0x174e   :  { %1410 = vrcp.f32 %v986_v12  ;;  %v998_v20 = vand.u32 2147483648, %v986_v12  ;;  %vm992_vm1 = vweird.f32 %v986_v12  ;;  %v996_v21 = vand.u32 2147483647, %v986_v12 }
0x174f   :  { %1412 = vtanh.f32 %v593_v28 }
0x1750   :  { %v999_v26 = vor.u32 1.1754944e-38, %v998_v20  ;;  %vm997_vm3 = vcmp.eq.f32.partialorder %v996_v21, 8.507059e+37 }
0x1754   :  { %v1411_v13 = vpop.eup %1410 }
0x1755   :  { %v988_v14 = vmul.f32 %v1411_v13, %v986_v12  ;;  %vm993_vm15 = vweird.f32 %v1411_v13  ;;  %v1413_v31 = vpop.eup %1412 }
0x1756   :  { %vm994_vm2 = vmor %vm992_vm1, %vm993_vm15 }
0x1757   :  { %v989_v15 = vsub.f32 1.0, %v988_v14 }
0x1759   :  { %v990_v2 = vmul.f32 %v1411_v13, %v989_v15 }
0x175b   :  { %v991_v19 = vadd.f32 %v1411_v13, %v990_v2 }
0x175d   :  { %v995_v22 = vsel %vm994_vm2, %v1411_v13, %v991_v19 }
0x175e   :  { %v1000_v30 = vsel %vm997_vm3, %v999_v26, %v995_v22 }
0x175f   :  { %v1003_v32 = vmul.f32 %v1000_v30, %v955_v55 }
0x17bc   :  { %v1006_v29 = vpop.permute.xlu1 %1005 }
0x17bd   :  { %v1008_v9 = vmul.f32 %v1006_v29, %v1000_v30 }
0x17bf   :  { %1010 = vrot.lane.b32.xlu2 %v1008_v9, %s1448_s15 }
0x17c7   :  { %616 = vrot.lane.b32.xlu2 %v1413_v31, %s1447_s12 }
0x1819   :  { %v1011_v16 = vpop.permute.xlu2 %1010 }
0x181a   :  { %v1762_v17 = vadd.f32 %v1011_v16, %v1003_v32 }
0x181c   :  { %1414 = vtanh.f32 %v1762_v17 }
0x181d   :  { %1416 = vpow2.f32 %v1266_v33 }
0x1821   :  { %v617_v49 = vpop.permute.xlu2 %616 }
0x1822   :  { %v1415_v59 = vpop.eup %1414 }
0x1823   :  { %1016 = vrot.lane.b32.xlu0 %v1415_v59, %s1447_s12  ;;  %v1417_v24 = vpop.eup %1416 }
0x1824   :  { %v597_v34 = vadd.f32 1.0, %v1417_v24 }
0x1826   :  { %1418 = vrcp.f32 %v597_v34  ;;  %v609_v36 = vand.u32 2147483648, %v597_v34  ;;  %vm603_vm5 = vweird.f32 %v597_v34  ;;  %v607_v46 = vand.u32 2147483647, %v597_v34 }
0x1828   :  { %v610_v48 = vor.u32 1.1754944e-38, %v609_v36  ;;  %vm608_vm7 = vcmp.eq.f32.partialorder %v607_v46, 8.507059e+37 }
0x182c   :  { %v1419_v35 = vpop.eup %1418 }
0x182d   :  { %v599_v39 = vmul.f32 %v1419_v35, %v597_v34  ;;  %vm604_vm4 = vweird.f32 %v1419_v35 }
0x182e   :  { %vm605_vm6 = vmor %vm603_vm5, %vm604_vm4  ;;  %vm1225_vm5 = vcmask 122880  }
0x182f   :  { %v600_v40 = vsub.f32 1.0, %v599_v39 }
0x1831   :  { %v601_v41 = vmul.f32 %v1419_v35, %v600_v40 }
0x1833   :  { %v602_v44 = vadd.f32 %v1419_v35, %v601_v41 }
0x1835   :  { %v606_v47 = vsel %vm605_vm6, %v1419_v35, %v602_v44 }
0x1836   :  { %v611_v50 = vsel %vm608_vm7, %v610_v48, %v606_v47 }
0x1837   :  { %v619_v37 = vmul.f32 %v617_v49, %v611_v50  ;;  %v614_v57 = vmul.f32 %v611_v50, %v1700_v6 }
0x1895   :  { %v1017_v42 = vpop.permute.xlu0 %1016 }
0x1896   :  { %v1019_v43 = vmul.f32 %v1017_v42, %v1000_v30 }
0x1898   :  { %v1020_v45 = vpack.c.bf16 %v1019_v43, %v1019_v43 }
0x189a   :  { %1022 = vrot.lane.b32.xlu1 %v1020_v45, %s1448_s15 }
0x18a2   :  { %621 = vrot.lane.b32.xlu1 %v619_v37, %s1448_s15 }
0x190c   :  { %v1023_v51 = vpop.permute.xlu1 %1022 }
0x190d   :  { %1299 = vmatmul.msk.bf16.vlgmr.msra.gmra.mxu0 %vm75_vm0, %v1023_v51 }
0x1914   :  { %v622_v56 = vpop.permute.xlu1 %621 }
0x1915   :  { %v624_v58 = vadd.f32 %v622_v56, %v614_v57 }
0x198a   :  { %v1036_v54 = vpop.f32.mrf.mxu0 }
0x198b   :  { %v1040_v55 = vadd.f32 %v1036_v54, %v706_v53 }
0x198d   :  { %1420 = vtanh.f32 %v1040_v55  ;;  %v1300_v61 = vmul.f32 -1.442695, %v1040_v55 }
0x198e   :  { %1422 = vtanh.f32 %v624_v58 }
0x198f   :  { %1424 = vpow2.f32 %v1300_v61 }
0x1992   :  { %v1038_v5 = vpop.f32.mrf.mxu0 }
0x1993   :  { %v1421_v38 = vpop.eup %1420 }
0x1994   :  { %1063 = vrot.lane.b32.xlu0 %v1421_v38, %s1447_s12  ;;  %v1423_v60 = vpop.eup %1422 }
0x1995   :  { %v1425_v62 = vpop.eup %1424 }
0x1996   :  { %v1044_v11 = vadd.f32 1.0, %v1425_v62 }
0x1998   :  { %1426 = vrcp.f32 %v1044_v11  ;;  %v1056_v6 = vand.u32 2147483648, %v1044_v11  ;;  %vm1050_vm9 = vweird.f32 %v1044_v11  ;;  %v1054_v7 = vand.u32 2147483647, %v1044_v11 }
0x199a   :  { %v1057_v10 = vor.u32 1.1754944e-38, %v1056_v6  ;;  %vm1055_vm11 = vcmp.eq.f32.partialorder %v1054_v7, 8.507059e+37 }
0x199c   :  { %627 = vrot.lane.b32.xlu0 %v1423_v60, %s1447_s12 }
0x199e   :  { %v1427_v63 = vpop.eup %1426 }
0x199f   :  { %v1046_v0 = vmul.f32 %v1427_v63, %v1044_v11  ;;  %vm1051_vm8 = vweird.f32 %v1427_v63 }
0x19a0   :  { %vm1052_vm10 = vmor %vm1050_vm9, %vm1051_vm8 }
0x19a1   :  { %v1047_v1 = vsub.f32 1.0, %v1046_v0 }
0x19a3   :  { %v1048_v3 = vmul.f32 %v1427_v63, %v1047_v1 }
0x19a5   :  { %v1049_v4 = vadd.f32 %v1427_v63, %v1048_v3 }
0x19a7   :  { %v1053_v8 = vsel %vm1052_vm10, %v1427_v63, %v1049_v4 }
0x19a8   :  { %v1058_v13 = vsel %vm1055_vm11, %v1057_v10, %v1053_v8 }
0x19a9   :  { %v1061_v19 = vmul.f32 %v1058_v13, %v1762_v17 }
0x1a06   :  { %v1064_v12 = vpop.permute.xlu0 %1063 }
0x1a07   :  { %v1066_v14 = vmul.f32 %v1064_v12, %v1058_v13 }
0x1a09   :  { %1068 = vrot.lane.b32.xlu2 %v1066_v14, %s1448_s15 }
0x1a0e   :  { %v628_v15 = vpop.permute.xlu0 %627 }
0x1a0f   :  { %v630_v2 = vmul.f32 %v628_v15, %v611_v50 }
0x1a11   :  { %569 = vrot.lane.b32.xlu2 %v1705_v18, %s1448_s15  ;;  %632 = vrot.lane.b32.xlu0 %v630_v2, %s1448_s15 }
0x1a63   :  { %v1069_v20 = vpop.permute.xlu2 %1068 }
0x1a64   :  { %v1071_v21 = vadd.f32 %v1069_v20, %v1061_v19 }
0x1a66   :  { %1428 = vtanh.f32 %v1071_v21 }
0x1a6b   :  { %v570_v22 = vpop.permute.xlu2 %569 }
0x1a6c   :  { %v1429_v23 = vpop.eup %1428  ;;  %572 = vst.msk [vmem:[#allocation2 + $0x30] sm:$0xff] %vm75_vm0, %v570_v22  ;;  %v1197_v22 = vld [vmem:[%s1823_s9 + $0x18] sm:$0xff] }
0x1a6d   :  { %1074 = vrot.lane.b32.xlu1 %v1429_v23, %s1447_s12  ;;  %v1196_v23 = vld [vmem:[%s1823_s9 + $0x10] sm:$0xff]  ;;  %1217 = vmatpush.msrb.mxu0 %v1197_v22 }
0x1a6f   :  { %1218 = vmatpush.msrb.mxu0 %v1196_v23 }
0x1a73   :  { %v642_v26 = vld [vmem:[#allocation2 + $0x30] sm:$0xff] }
0x1a83   :  { %v633_v25 = vpop.permute.xlu0 %632 }
0x1a84   :  { %635 = vst.msk [vmem:[#allocation2 + $0x38] sm:$0xff] %vm75_vm0, %v633_v25  ;;  %v1195_v25 = vld [vmem:[%s1823_s9 + $0x8] sm:$0xff] }
0x1a85   :  { %1219 = vmatpush.msrb.mxu0 %v1195_v25 }
0x1a8b   :  { %v643_v28 = vld [vmem:[#allocation2 + $0x38] sm:$0xff] }
0x1a8c   :  { %v655_v29 = vpack.c.bf16 %v643_v28, %v642_v26  ;;  %v1194_v26 = vld [vmem:[%s1823_s9] sm:$0xff] }
0x1a8d   :  { %1220 = vmatpush.msrb.mxu0 %v1194_v26 }
0x1a8e   :  { %1278 = vmatmul.msk.bf16.gmra.mxu3 %vm75_vm0, %v655_v29 }
0x1adf   :  { %v1075_v18 = vpop.permute.xlu1 %1074 }
0x1ae0   :  { %v1077_v30 = vmul.f32 %v1075_v18, %v1058_v13 }
0x1ae2   :  { %v1078_v9 = vpack.c.bf16 %v1077_v30, %v1077_v30 }
0x1ae4   :  { %1080 = vrot.lane.b32.xlu1 %v1078_v9, %s1448_s15  ;;  %v1198_v9 = vld [vmem:[%s1824_s10] sm:$0x1] }
0x1b11   :  { %v708_v32 = vpop.f32.mrf.mxu3 }
0x1b12   :  { %v709_v16 = vadd.f32 %v1689_v27, %v708_v32 }
0x1b19   :  { %v710_v58 = vpop.f32.mrf.mxu3 }
0x1b1a   :  { %v711_v5 = vadd.f32 %v1689_v27, %v710_v58 }
0x1b56   :  { %v1081_v31 = vpop.permute.xlu1 %1080 }
0x1b57   :  { %1301 = vmatmul.msk.bf16.vlgmr.msrb.gmra.mxu1 %vm75_vm0, %v1081_v31 }
0x1bd4   :  { %v1094_v17 = vpop.f32.mrf.mxu1 }
0x1bd5   :  { %v1098_v59 = vadd.f32 %v1094_v17, %v709_v16 }
0x1bd7   :  { %1430 = vtanh.f32 %v1098_v59  ;;  %v1302_v34 = vmul.f32 -1.442695, %v1098_v59 }
0x1bd9   :  { %1432 = vpow2.f32 %v1302_v34 }
0x1bdc   :  { %v1096_v33 = vpop.f32.mrf.mxu1 }
0x1bdd   :  { %v1431_v24 = vpop.eup %1430 }
0x1bde   :  { %1121 = vrot.lane.b32.xlu2 %v1431_v24, %s1447_s12 }
0x1bdf   :  { %v1433_v35 = vpop.eup %1432 }
0x1be0   :  { %v1102_v39 = vadd.f32 1.0, %v1433_v35 }
0x1be2   :  { %1434 = vrcp.f32 %v1102_v39  ;;  %v1114_v45 = vand.u32 2147483648, %v1102_v39  ;;  %vm1108_vm13 = vweird.f32 %v1102_v39  ;;  %v1112_v36 = vand.u32 2147483647, %v1102_v39 }
0x1be4   :  { %v1115_v47 = vor.u32 1.1754944e-38, %v1114_v45  ;;  %vm1113_vm15 = vcmp.eq.f32.partialorder %v1112_v36, 8.507059e+37 }
0x1be8   :  { %v1435_v40 = vpop.eup %1434 }
0x1be9   :  { %v1104_v41 = vmul.f32 %v1435_v40, %v1102_v39  ;;  %vm1109_vm12 = vweird.f32 %v1435_v40 }
0x1bea   :  { %vm1110_vm14 = vmor %vm1108_vm13, %vm1109_vm12 }
0x1beb   :  { %v1105_v42 = vsub.f32 1.0, %v1104_v41 }
0x1bed   :  { %v1106_v43 = vmul.f32 %v1435_v40, %v1105_v42 }
0x1bef   :  { %v1107_v44 = vadd.f32 %v1435_v40, %v1106_v43 }
0x1bf1   :  { %v1111_v46 = vsel %vm1110_vm14, %v1435_v40, %v1107_v44 }
0x1bf2   :  { %v1116_v49 = vsel %vm1113_vm15, %v1115_v47, %v1111_v46 }
0x1bf3   :  { %v1119_v37 = vmul.f32 %v1116_v49, %v1071_v21 }
0x1c38   :  { %v1122_v48 = vpop.permute.xlu2 %1121 }
0x1c39   :  { %v1124_v50 = vmul.f32 %v1122_v48, %v1116_v49 }
0x1c3b   :  { %1126 = vrot.lane.b32.xlu0 %v1124_v50, %s1448_s15 }
0x1cad   :  { %v1127_v51 = vpop.permute.xlu0 %1126 }
0x1cae   :  { %v1129_v52 = vadd.f32 %v1127_v51, %v1119_v37 }
0x1cb0   :  { %1436 = vtanh.f32 %v1129_v52 }
0x1cb6   :  { %v1437_v53 = vpop.eup %1436 }
0x1cb7   :  { %1132 = vrot.lane.b32.xlu1 %v1437_v53, %s1447_s12 }
0x1d29   :  { %v1133_v54 = vpop.permute.xlu1 %1132 }
0x1d2a   :  { %v1135_v55 = vmul.f32 %v1133_v54, %v1116_v49 }
0x1d2c   :  { %v1136_v56 = vpack.c.bf16 %v1135_v55, %v1135_v55 }
0x1d2e   :  { %1138 = vrot.lane.b32.xlu2 %v1136_v56, %s1448_s15 }
0x1d88   :  { %v1139_v57 = vpop.permute.xlu2 %1138 }
0x1d89   :  { %1303 = vmatmul.msk.bf16.vlgmr.msrb.gmra.mxu2 %vm75_vm0, %v1139_v57 }
0x1e0c   :  { %v1152_v38 = vpop.f32.mrf.mxu2 }
0x1e0d   :  { %v1156_v60 = vadd.f32 %v1152_v38, %v711_v5 }
0x1e0f   :  { %1438 = vtanh.f32 %v1156_v60  ;;  %v1304_v11 = vmul.f32 -1.442695, %v1156_v60 }
0x1e11   :  { %1440 = vpow2.f32 %v1304_v11 }
0x1e14   :  { %v1154_v61 = vpop.f32.mrf.mxu2 }
0x1e15   :  { %v1439_v62 = vpop.eup %1438 }
0x1e16   :  { %1179 = vrot.lane.b32.xlu0 %v1439_v62, %s1447_s12 }
0x1e17   :  { %v1441_v63 = vpop.eup %1440 }
0x1e18   :  { %v1160_v0 = vadd.f32 1.0, %v1441_v63 }
0x1e1a   :  { %1442 = vrcp.f32 %v1160_v0  ;;  %v1172_v8 = vand.u32 2147483648, %v1160_v0  ;;  %vm1166_vm2 = vweird.f32 %v1160_v0  ;;  %v1170_v27 = vand.u32 2147483647, %v1160_v0 }
0x1e1c   :  { %v1173_v12 = vor.u32 1.1754944e-38, %v1172_v8  ;;  %vm1171_vm4 = vcmp.eq.f32.partialorder %v1170_v27, 8.507059e+37 }
0x1e20   :  { %v1443_v1 = vpop.eup %1442 }
0x1e21   :  { %v1162_v3 = vmul.f32 %v1443_v1, %v1160_v0  ;;  %vm1167_vm1 = vweird.f32 %v1443_v1 }
0x1e22   :  { %vm1168_vm3 = vmor %vm1166_vm2, %vm1167_vm1 }
0x1e23   :  { %v1163_v4 = vsub.f32 1.0, %v1162_v3 }
0x1e25   :  { %v1164_v6 = vmul.f32 %v1443_v1, %v1163_v4 }
0x1e27   :  { %v1165_v7 = vadd.f32 %v1443_v1, %v1164_v6 }
0x1e29   :  { %v1169_v10 = vsel %vm1168_vm3, %v1443_v1, %v1165_v7 }
0x1e2a   :  { %v1174_v14 = vsel %vm1171_vm4, %v1173_v12, %v1169_v10 }
0x1e2b   :  { %v1177_v2 = vmul.f32 %v1174_v14, %v1129_v52 }
0x1e88   :  { %v1180_v13 = vpop.permute.xlu0 %1179 }
0x1e89   :  { %v1182_v15 = vmul.f32 %v1180_v13, %v1174_v14 }
0x1e8b   :  { %1184 = vrot.lane.b32.xlu1 %v1182_v15, %s1448_s15 }
0x1efd   :  { %v1185_v19 = vpop.permute.xlu1 %1184 }
0x1efe   :  { %v1187_v20 = vadd.f32 %v1185_v19, %v1177_v2 }
0x1f00   :  { %1444 = vtanh.f32 %v1187_v20 }
0x1f06   :  { %v1445_v21 = vpop.eup %1444 }
0x1f07   :  { %1190 = vrot.lane.b32.xlu2 %v1445_v21, %s1447_s12 }
0x1f61   :  { %v1191_v28 = vpop.permute.xlu2 %1190 }
0x1f62   :  { %v1193_v29 = vmul.f32 %v1191_v28, %v1174_v14 }
0x1f64   :  { %v1200_v18 = vrot.slane %v1193_v29, 3 }
0x1f66   :  { %1201 = vrot.lane.b32.xlu0 %v1200_v18, %s1448_s15 }
0x1fd8   :  { %v1202_v30 = vpop.permute.xlu0 %1201 }
0x1fd9   :  { %1305 = vmatmul.msk.f32.vlgmr.msrb.gmra.mxu0 %vm75_vm0, %v1202_v30 }
0x2056   :  { %v1222_v31 = vpop.f32.mrf.mxu0 }
0x2057   :  { %v1223_v32 = vadd.f32 %v1222_v31, %v1198_v9 }
0x2059   :  { %1226 = vst.msk [vmem:[%s1825_s11] sm:$0x1] %vm1225_vm5, %v1223_v32 }

</bundles_post_ra>
